<compile_context>
chip_gen: v6e
topology: v6e:2x2x1
jax: 0.10.0
libtpu: 0.0.40
codegen_flags: <defaults>
</compile_context>

<pallas_src>
import functools
import math

import jax
import jax.numpy as jnp
from jax.experimental import pallas as pl
from jax.experimental.pallas import tpu as pltpu


# ----------------------------------------------------------------------------
# Fused kernel: conv1 + BN1 + ReLU + conv2 + BN2 + ReLU.
#   Activations:  (N*H, W*C)            channels interleaved on lanes
#   Conv weights: (3, (W+2)*Cin, W*Cout) banded per-row-tap matrices
# ----------------------------------------------------------------------------
def _double_conv_kernel(xp_ref, wb1_ref, b1_ref, g1_ref, be1_ref, selm_ref,
                        wb2_ref, b2_ref, g2_ref, be2_ref, selo_ref,
                        o_ref, y1p_ref, *, N, H, W, Cin, Cmid, Cout, eps):
    NH = N * H
    Wp = W + 2
    inv_cnt = 1.0 / float(N * H * W)

    def bn_relu(z, sel, gamma_l, beta_l):
        # z: (NH, W*C).  Per-channel batch stats via lane-group matmul reduce,
        # broadcast back to the interleaved lane pattern with jnp.tile.
        mean_c = jnp.dot(jnp.sum(z, axis=0, keepdims=True), sel,
                         preferred_element_type=jnp.float32) * inv_cnt     # (1, C)
        zc = z - jnp.tile(mean_c, (1, W))
        var_c = jnp.dot(jnp.sum(zc * zc, axis=0, keepdims=True), sel,
                        preferred_element_type=jnp.float32) * inv_cnt      # (1, C)
        scale_l = gamma_l * jnp.tile(jax.lax.rsqrt(var_c + eps), (1, W))   # (1, W*C)
        return jnp.maximum(zc * scale_l + beta_l, 0.0)

    # ---- conv1: 3 row taps, each one banded (W,Cin)->(W,Cmid) MXU matmul ----
    z1 = jnp.zeros((NH, W * Cmid), jnp.float32)
    for dy in range(3):
        a = xp_ref[:, dy:dy + H, :].reshape(NH, Wp * Cin)   # free reshape (H%8==0)
        z1 = z1 + jnp.dot(a, wb1_ref[dy], preferred_element_type=jnp.float32)
    z1 = z1 + b1_ref[...]                                   # pre-tiled bias row
    y1 = bn_relu(z1, selm_ref[...], g1_ref[...], be1_ref[...])

    # ---- conv1 -> conv2 intermediate: zero-padded halo, stays in VMEM -------
    # Rows 0 / H+1 and lanes [W*Cmid:] stay zero; data lands lane-aligned at 0.
    y1p_ref[...] = jnp.zeros_like(y1p_ref)
    y1p_ref[:, 1:H + 1, 0:W * Cmid] = y1.reshape(N, H, W * Cmid)

    # ---- conv2 ---------------------------------------------------------------
    z2 = jnp.zeros((NH, W * Cout), jnp.float32)
    for dy in range(3):
        a = y1p_ref[:, dy:dy + H, :].reshape(NH, Wp * Cmid)
        z2 = z2 + jnp.dot(a, wb2_ref[dy], preferred_element_type=jnp.float32)
    z2 = z2 + b2_ref[...]
    y2 = bn_relu(z2, selo_ref[...], g2_ref[...], be2_ref[...])

    o_ref[...] = y2.reshape(N, H, W * Cout)                 # lane-dense output


# ----------------------------------------------------------------------------
# Host-side layout glue.
# ----------------------------------------------------------------------------
def _banded_weight(w, W, left_pad):
    """OIHW 3x3 weight -> (3, (W+2)*Cin, W*Cout) block-banded row-tap matrices.

    Input-buffer column `col` holds original image column `col - left_pad`;
    columns outside the valid range are assumed to be zero in the buffer.
    """
    Cout, Cin = w.shape[0], w.shape[1]
    wt = jnp.transpose(w, (2, 3, 1, 0)).astype(jnp.float32)      # (3, 3, Cin, Cout)
    Wp = W + 2
    taps = []
    for dy in range(3):
        m = jnp.zeros((Wp * Cin, W * Cout), jnp.float32)
        for dx in range(3):
            shift = jnp.eye(Wp, W, k=-(dx - 1 + left_pad), dtype=jnp.float32)
            m = m + jnp.kron(shift, wt[dy, dx])
        taps.append(m)
    return jnp.stack(taps, axis=0)


@functools.partial(jax.jit, static_argnames=("eps",))
def double_conv_forward(x, w1, b1, g1, be1, w2, b2, g2, be2, eps=1e-5):
    N, Cin, H, W = x.shape
    Cmid = w1.shape[0]
    Cout = w2.shape[0]
    Wp = W + 2

    # NCHW -> zero-padded NHWC with (W, C) flattened onto the lane dim.
    xp = jnp.pad(jnp.transpose(x, (0, 2, 3, 1)),
                 ((0, 0), (1, 1), (1, 1), (0, 0))).reshape(N, H + 2, Wp * Cin)

    wb1 = _banded_weight(w1, W, left_pad=1)      # (3, Wp*Cin,  W*Cmid)
    wb2 = _banded_weight(w2, W, left_pad=0)      # (3, Wp*Cmid, W*Cout)

    def lanes(v, C):                             # per-channel vec -> (1, W*C)
        return jnp.tile(v.reshape(1, C).astype(jnp.float32), (1, W))

    sel_m = jnp.tile(jnp.eye(Cmid, dtype=jnp.float32), (W, 1))   # (W*Cmid, Cmid)
    sel_o = jnp.tile(jnp.eye(Cout, dtype=jnp.float32), (W, 1))   # (W*Cout, Cout)

    kernel = functools.partial(_double_conv_kernel, N=N, H=H, W=W,
                               Cin=Cin, Cmid=Cmid, Cout=Cout, eps=eps)

    out = pl.pallas_call(
        kernel,
        out_shape=jax.ShapeDtypeStruct((N, H, W * Cout), jnp.float32),
        grid=(1,),
        in_specs=[
            pl.BlockSpec((N, H + 2, Wp * Cin), lambda i: (0, 0, 0)),
            pl.BlockSpec((3, Wp * Cin, W * Cmid), lambda i: (0, 0, 0)),
            pl.BlockSpec((1, W * Cmid), lambda i: (0, 0)),
            pl.BlockSpec((1, W * Cmid), lambda i: (0, 0)),
            pl.BlockSpec((1, W * Cmid), lambda i: (0, 0)),
            pl.BlockSpec((W * Cmid, Cmid), lambda i: (0, 0)),
            pl.BlockSpec((3, Wp * Cmid, W * Cout), lambda i: (0, 0, 0)),
            pl.BlockSpec((1, W * Cout), lambda i: (0, 0)),
            pl.BlockSpec((1, W * Cout), lambda i: (0, 0)),
            pl.BlockSpec((1, W * Cout), lambda i: (0, 0)),
            pl.BlockSpec((W * Cout, Cout), lambda i: (0, 0)),
        ],
        out_specs=pl.BlockSpec((N, H, W * Cout), lambda i: (0, 0, 0)),
        scratch_shapes=[pltpu.VMEM((N, H + 2, Wp * Cmid), jnp.float32)],
        compiler_params=pltpu.CompilerParams(
            dimension_semantics=("arbitrary",)),
    )(xp, wb1, lanes(b1, Cmid), lanes(g1, Cmid), lanes(be1, Cmid), sel_m,
      wb2, lanes(b2, Cout), lanes(g2, Cout), lanes(be2, Cout), sel_o)

    return jnp.transpose(out.reshape(N, H, W, Cout), (0, 3, 1, 2))


# ----------------------------------------------------------------------------
# Pure-JAX reference (independent formulation via lax.conv).
# ----------------------------------------------------------------------------
def double_conv_ref(x, w1, b1, g1, be1, w2, b2, g2, be2, eps=1e-5):
    def block(x, w, b, g, beta):
        y = jax.lax.conv_general_dilated(
            x, w, window_strides=(1, 1), padding=((1, 1), (1, 1)),
            dimension_numbers=("NCHW", "OIHW", "NCHW"),
            precision=jax.lax.Precision.HIGHEST)
        y = y + b[None, :, None, None]
        m = jnp.mean(y, axis=(0, 2, 3), keepdims=True)
        v = jnp.mean((y - m) ** 2, axis=(0, 2, 3), keepdims=True)
        y = (y - m) * jax.lax.rsqrt(v + eps) * g[None, :, None, None] \
            + beta[None, :, None, None]
        return jnp.maximum(y, 0.0)

    return block(block(x, w1, b1, g1, be1), w2, b2, g2, be2)


# ----------------------------------------------------------------------------
if __name__ == "__main__":
    # DoubleConv(in_channels=4, out_channels=16) on a (2, 4, 16, 16) input.
    N, Cin, Cout, H, W = 2, 4, 16, 16, 16
    Cmid = Cout

    key = jax.random.PRNGKey(0)
    ks = jax.random.split(key, 9)

    x = jax.random.normal(ks[0], (N, Cin, H, W), jnp.float32)

    k1 = 1.0 / math.sqrt(Cin * 9)
    w1 = jax.random.uniform(ks[1], (Cmid, Cin, 3, 3), jnp.float32, -k1, k1)
    b1 = jax.random.uniform(ks[2], (Cmid,), jnp.float32, -k1, k1)
    g1 = jax.random.uniform(ks[3], (Cmid,), jnp.float32, 0.5, 1.5)
    be1 = jax.random.uniform(ks[4], (Cmid,), jnp.float32, -0.5, 0.5)

    k2 = 1.0 / math.sqrt(Cmid * 9)
    w2 = jax.random.uniform(ks[5], (Cout, Cmid, 3, 3), jnp.float32, -k2, k2)
    b2 = jax.random.uniform(ks[6], (Cout,), jnp.float32, -k2, k2)
    g2 = jax.random.uniform(ks[7], (Cout,), jnp.float32, 0.5, 1.5)
    be2 = jax.random.uniform(ks[8], (Cout,), jnp.float32, -0.5, 0.5)

    out = double_conv_forward(x, w1, b1, g1, be1, w2, b2, g2, be2)
    jax.block_until_ready(out)

    ref = double_conv_ref(x, w1, b1, g1, be1, w2, b2, g2, be2)
    assert out.shape == (N, Cout, H, W)
    err = float(jnp.max(jnp.abs(out - ref)))
    assert jnp.allclose(out, ref, rtol=1e-3, atol=1e-3), err

    print("KERNEL_OK")
</pallas_src>

<mosaic_0001>
module attributes {stable_mosaic.version = 11 : i64} {
  func.func @_double_conv_kernel(%arg0: i32, %arg1: memref<2x18x72xf32, #tpu.memory_space<vmem>>, %arg2: memref<3x72x256xf32, #tpu.memory_space<vmem>>, %arg3: memref<1x256xf32, #tpu.memory_space<vmem>>, %arg4: memref<1x256xf32, #tpu.memory_space<vmem>>, %arg5: memref<1x256xf32, #tpu.memory_space<vmem>>, %arg6: memref<256x16xf32, #tpu.memory_space<vmem>>, %arg7: memref<3x288x256xf32, #tpu.memory_space<vmem>>, %arg8: memref<1x256xf32, #tpu.memory_space<vmem>>, %arg9: memref<1x256xf32, #tpu.memory_space<vmem>>, %arg10: memref<1x256xf32, #tpu.memory_space<vmem>>, %arg11: memref<256x16xf32, #tpu.memory_space<vmem>>, %arg12: memref<2x16x256xf32, #tpu.memory_space<vmem>>, %arg13: memref<2x18x288xf32, #tpu.memory_space<vmem>>) attributes {dimension_semantics = [#tpu.dimension_semantics<arbitrary>], iteration_bounds = array<i64: 1>, scalar_prefetch = 0 : i64, scratch_operands = 1 : i64, tpu.core_type = #tpu.core_type<tc>, window_params = [{pipeline_mode = #tpu.pipeline_mode<synchronous>, transform_indices = @transform_0, window_bounds = array<i64: 2, 18, 72>}, {pipeline_mode = #tpu.pipeline_mode<synchronous>, transform_indices = @transform_1, window_bounds = array<i64: 3, 72, 256>}, {pipeline_mode = #tpu.pipeline_mode<synchronous>, transform_indices = @transform_2, window_bounds = array<i64: 1, 256>}, {pipeline_mode = #tpu.pipeline_mode<synchronous>, transform_indices = @transform_3, window_bounds = array<i64: 1, 256>}, {pipeline_mode = #tpu.pipeline_mode<synchronous>, transform_indices = @transform_4, window_bounds = array<i64: 1, 256>}, {pipeline_mode = #tpu.pipeline_mode<synchronous>, transform_indices = @transform_5, window_bounds = array<i64: 256, 16>}, {pipeline_mode = #tpu.pipeline_mode<synchronous>, transform_indices = @transform_6, window_bounds = array<i64: 3, 288, 256>}, {pipeline_mode = #tpu.pipeline_mode<synchronous>, transform_indices = @transform_7, window_bounds = array<i64: 1, 256>}, {pipeline_mode = #tpu.pipeline_mode<synchronous>, transform_indices = @transform_8, window_bounds = array<i64: 1, 256>}, {pipeline_mode = #tpu.pipeline_mode<synchronous>, transform_indices = @transform_9, window_bounds = array<i64: 1, 256>}, {pipeline_mode = #tpu.pipeline_mode<synchronous>, transform_indices = @transform_10, window_bounds = array<i64: 256, 16>}, {pipeline_mode = #tpu.pipeline_mode<synchronous>, transform_indices = @transform_11, window_bounds = array<i64: 2, 16, 256>}]} {
    %cst = arith.constant 0.000000e+00 : f32
    %0 = vector.broadcast %cst : f32 to vector<32x256xf32>
    %c0 = arith.constant 0 : index
    %c0_0 = arith.constant 0 : index
    %c0_1 = arith.constant 0 : index
    %1 = vector.load %arg1[%c0, %c0_0, %c0_1] : memref<2x18x72xf32, #tpu.memory_space<vmem>>, vector<2x16x72xf32>
    %2 = vector.shape_cast %1 : vector<2x16x72xf32> to vector<32x72xf32>
    %c0_2 = arith.constant 0 : index
    %c0_3 = arith.constant 0 : index
    %c0_4 = arith.constant 0 : index
    %3 = vector.load %arg2[%c0_2, %c0_3, %c0_4] : memref<3x72x256xf32, #tpu.memory_space<vmem>>, vector<1x72x256xf32>
    %4 = vector.shape_cast %3 : vector<1x72x256xf32> to vector<72x256xf32>
    %cst_5 = arith.constant dense<0.000000e+00> : vector<32x256xf32>
    %5 = tpu.matmul %2, %4, %cst_5 {dimension_numbers = #tpu.dot_dimension_numbers<[1], [0], [0], [1], [0, 0, 1, 1], [], []>} : vector<32x72xf32>, vector<72x256xf32>, vector<32x256xf32> -> vector<32x256xf32>
    %6 = arith.addf %0, %5 : vector<32x256xf32>
    %c0_6 = arith.constant 0 : index
    %c1 = arith.constant 1 : index
    %c0_7 = arith.constant 0 : index
    %7 = vector.load %arg1[%c0_6, %c1, %c0_7] : memref<2x18x72xf32, #tpu.memory_space<vmem>>, vector<2x16x72xf32>
    %8 = vector.shape_cast %7 : vector<2x16x72xf32> to vector<32x72xf32>
    %c1_8 = arith.constant 1 : index
    %c0_9 = arith.constant 0 : index
    %c0_10 = arith.constant 0 : index
    %9 = vector.load %arg2[%c1_8, %c0_9, %c0_10] : memref<3x72x256xf32, #tpu.memory_space<vmem>>, vector<1x72x256xf32>
    %10 = vector.shape_cast %9 : vector<1x72x256xf32> to vector<72x256xf32>
    %cst_11 = arith.constant dense<0.000000e+00> : vector<32x256xf32>
    %11 = tpu.matmul %8, %10, %cst_11 {dimension_numbers = #tpu.dot_dimension_numbers<[1], [0], [0], [1], [0, 0, 1, 1], [], []>} : vector<32x72xf32>, vector<72x256xf32>, vector<32x256xf32> -> vector<32x256xf32>
    %12 = arith.addf %6, %11 : vector<32x256xf32>
    %c0_12 = arith.constant 0 : index
    %c2 = arith.constant 2 : index
    %c0_13 = arith.constant 0 : index
    %13 = vector.load %arg1[%c0_12, %c2, %c0_13] : memref<2x18x72xf32, #tpu.memory_space<vmem>>, vector<2x16x72xf32>
    %14 = vector.shape_cast %13 : vector<2x16x72xf32> to vector<32x72xf32>
    %c2_14 = arith.constant 2 : index
    %c0_15 = arith.constant 0 : index
    %c0_16 = arith.constant 0 : index
    %15 = vector.load %arg2[%c2_14, %c0_15, %c0_16] : memref<3x72x256xf32, #tpu.memory_space<vmem>>, vector<1x72x256xf32>
    %16 = vector.shape_cast %15 : vector<1x72x256xf32> to vector<72x256xf32>
    %cst_17 = arith.constant dense<0.000000e+00> : vector<32x256xf32>
    %17 = tpu.matmul %14, %16, %cst_17 {dimension_numbers = #tpu.dot_dimension_numbers<[1], [0], [0], [1], [0, 0, 1, 1], [], []>} : vector<32x72xf32>, vector<72x256xf32>, vector<32x256xf32> -> vector<32x256xf32>
    %18 = arith.addf %12, %17 : vector<32x256xf32>
    %c0_18 = arith.constant 0 : index
    %c0_19 = arith.constant 0 : index
    %19 = vector.load %arg3[%c0_18, %c0_19] : memref<1x256xf32, #tpu.memory_space<vmem>>, vector<1x256xf32>
    %20 = vector.broadcast %19 : vector<1x256xf32> to vector<32x256xf32>
    %21 = arith.addf %18, %20 : vector<32x256xf32>
    %c0_20 = arith.constant 0 : index
    %c0_21 = arith.constant 0 : index
    %22 = vector.load %arg6[%c0_20, %c0_21] : memref<256x16xf32, #tpu.memory_space<vmem>>, vector<256x16xf32>
    %c0_22 = arith.constant 0 : index
    %c0_23 = arith.constant 0 : index
    %23 = vector.load %arg4[%c0_22, %c0_23] : memref<1x256xf32, #tpu.memory_space<vmem>>, vector<1x256xf32>
    %c0_24 = arith.constant 0 : index
    %c0_25 = arith.constant 0 : index
    %24 = vector.load %arg5[%c0_24, %c0_25] : memref<1x256xf32, #tpu.memory_space<vmem>>, vector<1x256xf32>
    %cst_26 = arith.constant dense<0.000000e+00> : vector<256xf32>
    %25 = vector.multi_reduction <add>, %21, %cst_26 [0] : vector<32x256xf32> to vector<256xf32>
    %26 = vector.shape_cast %25 : vector<256xf32> to vector<1x256xf32>
    %cst_27 = arith.constant dense<0.000000e+00> : vector<1x16xf32>
    %27 = tpu.matmul %26, %22, %cst_27 {dimension_numbers = #tpu.dot_dimension_numbers<[1], [0], [0], [1], [0, 0, 1, 1], [], []>} : vector<1x256xf32>, vector<256x16xf32>, vector<1x16xf32> -> vector<1x16xf32>
    %cst_28 = arith.constant 0.001953125 : f32
    %28 = vector.broadcast %cst_28 : f32 to vector<1x16xf32>
    %29 = arith.mulf %27, %28 : vector<1x16xf32>
    %30 = tpu.concatenate %29, %29, %29, %29, %29, %29, %29, %29, %29, %29, %29, %29, %29, %29, %29, %29 in 1 : vector<1x16xf32>, vector<1x16xf32>, vector<1x16xf32>, vector<1x16xf32>, vector<1x16xf32>, vector<1x16xf32>, vector<1x16xf32>, vector<1x16xf32>, vector<1x16xf32>, vector<1x16xf32>, vector<1x16xf32>, vector<1x16xf32>, vector<1x16xf32>, vector<1x16xf32>, vector<1x16xf32>, vector<1x16xf32> -> vector<1x256xf32>
    %31 = vector.broadcast %30 : vector<1x256xf32> to vector<32x256xf32>
    %32 = arith.subf %21, %31 : vector<32x256xf32>
    %33 = arith.mulf %32, %32 : vector<32x256xf32>
    %cst_29 = arith.constant dense<0.000000e+00> : vector<256xf32>
    %34 = vector.multi_reduction <add>, %33, %cst_29 [0] : vector<32x256xf32> to vector<256xf32>
    %35 = vector.shape_cast %34 : vector<256xf32> to vector<1x256xf32>
    %cst_30 = arith.constant dense<0.000000e+00> : vector<1x16xf32>
    %36 = tpu.matmul %35, %22, %cst_30 {dimension_numbers = #tpu.dot_dimension_numbers<[1], [0], [0], [1], [0, 0, 1, 1], [], []>} : vector<1x256xf32>, vector<256x16xf32>, vector<1x16xf32> -> vector<1x16xf32>
    %cst_31 = arith.constant 0.001953125 : f32
    %37 = vector.broadcast %cst_31 : f32 to vector<1x16xf32>
    %38 = arith.mulf %36, %37 : vector<1x16xf32>
    %cst_32 = arith.constant 9.99999974E-6 : f32
    %39 = vector.broadcast %cst_32 : f32 to vector<1x16xf32>
    %40 = arith.addf %38, %39 : vector<1x16xf32>
    %41 = math.rsqrt %40 : vector<1x16xf32>
    %42 = tpu.concatenate %41, %41, %41, %41, %41, %41, %41, %41, %41, %41, %41, %41, %41, %41, %41, %41 in 1 : vector<1x16xf32>, vector<1x16xf32>, vector<1x16xf32>, vector<1x16xf32>, vector<1x16xf32>, vector<1x16xf32>, vector<1x16xf32>, vector<1x16xf32>, vector<1x16xf32>, vector<1x16xf32>, vector<1x16xf32>, vector<1x16xf32>, vector<1x16xf32>, vector<1x16xf32>, vector<1x16xf32>, vector<1x16xf32> -> vector<1x256xf32>
    %43 = arith.mulf %23, %42 : vector<1x256xf32>
    %44 = vector.broadcast %43 : vector<1x256xf32> to vector<32x256xf32>
    %45 = arith.mulf %32, %44 : vector<32x256xf32>
    %46 = vector.broadcast %24 : vector<1x256xf32> to vector<32x256xf32>
    %47 = arith.addf %45, %46 : vector<32x256xf32>
    %cst_33 = arith.constant 0.000000e+00 : f32
    %48 = vector.broadcast %cst_33 : f32 to vector<32x256xf32>
    %49 = arith.maximumf %47, %48 : vector<32x256xf32>
    %cst_34 = arith.constant 0.000000e+00 : f32
    %50 = vector.broadcast %cst_34 : f32 to vector<2x18x288xf32>
    %c0_35 = arith.constant 0 : index
    %c0_36 = arith.constant 0 : index
    %c0_37 = arith.constant 0 : index
    %51 = vector.load %arg13[%c0_35, %c0_36, %c0_37] : memref<2x18x288xf32, #tpu.memory_space<vmem>>, vector<2x18x288xf32>
    tpu.vector_store %arg13[%c0_35, %c0_36, %c0_37], %50 {strides = array<i32>} : memref<2x18x288xf32, #tpu.memory_space<vmem>>, vector<2x18x288xf32>,
    %52 = vector.shape_cast %49 : vector<32x256xf32> to vector<2x16x256xf32>
    %c0_38 = arith.constant 0 : index
    %c1_39 = arith.constant 1 : index
    %c0_40 = arith.constant 0 : index
    %53 = vector.load %arg13[%c0_38, %c1_39, %c0_40] : memref<2x18x288xf32, #tpu.memory_space<vmem>>, vector<2x16x256xf32>
    tpu.vector_store %arg13[%c0_38, %c1_39, %c0_40], %52 {strides = array<i32>} : memref<2x18x288xf32, #tpu.memory_space<vmem>>, vector<2x16x256xf32>,
    %cst_41 = arith.constant 0.000000e+00 : f32
    %54 = vector.broadcast %cst_41 : f32 to vector<32x256xf32>
    %c0_42 = arith.constant 0 : index
    %c0_43 = arith.constant 0 : index
    %c0_44 = arith.constant 0 : index
    %55 = vector.load %arg13[%c0_42, %c0_43, %c0_44] : memref<2x18x288xf32, #tpu.memory_space<vmem>>, vector<2x16x288xf32>
    %56 = vector.shape_cast %55 : vector<2x16x288xf32> to vector<32x288xf32>
    %c0_45 = arith.constant 0 : index
    %c0_46 = arith.constant 0 : index
    %c0_47 = arith.constant 0 : index
    %57 = vector.load %arg7[%c0_45, %c0_46, %c0_47] : memref<3x288x256xf32, #tpu.memory_space<vmem>>, vector<1x288x256xf32>
    %58 = vector.shape_cast %57 : vector<1x288x256xf32> to vector<288x256xf32>
    %cst_48 = arith.constant dense<0.000000e+00> : vector<32x256xf32>
    %59 = tpu.matmul %56, %58, %cst_48 {dimension_numbers = #tpu.dot_dimension_numbers<[1], [0], [0], [1], [0, 0, 1, 1], [], []>} : vector<32x288xf32>, vector<288x256xf32>, vector<32x256xf32> -> vector<32x256xf32>
    %60 = arith.addf %54, %59 : vector<32x256xf32>
    %c0_49 = arith.constant 0 : index
    %c1_50 = arith.constant 1 : index
    %c0_51 = arith.constant 0 : index
    %61 = vector.load %arg13[%c0_49, %c1_50, %c0_51] : memref<2x18x288xf32, #tpu.memory_space<vmem>>, vector<2x16x288xf32>
    %62 = vector.shape_cast %61 : vector<2x16x288xf32> to vector<32x288xf32>
    %c1_52 = arith.constant 1 : index
    %c0_53 = arith.constant 0 : index
    %c0_54 = arith.constant 0 : index
    %63 = vector.load %arg7[%c1_52, %c0_53, %c0_54] : memref<3x288x256xf32, #tpu.memory_space<vmem>>, vector<1x288x256xf32>
    %64 = vector.shape_cast %63 : vector<1x288x256xf32> to vector<288x256xf32>
    %cst_55 = arith.constant dense<0.000000e+00> : vector<32x256xf32>
    %65 = tpu.matmul %62, %64, %cst_55 {dimension_numbers = #tpu.dot_dimension_numbers<[1], [0], [0], [1], [0, 0, 1, 1], [], []>} : vector<32x288xf32>, vector<288x256xf32>, vector<32x256xf32> -> vector<32x256xf32>
    %66 = arith.addf %60, %65 : vector<32x256xf32>
    %c0_56 = arith.constant 0 : index
    %c2_57 = arith.constant 2 : index
    %c0_58 = arith.constant 0 : index
    %67 = vector.load %arg13[%c0_56, %c2_57, %c0_58] : memref<2x18x288xf32, #tpu.memory_space<vmem>>, vector<2x16x288xf32>
    %68 = vector.shape_cast %67 : vector<2x16x288xf32> to vector<32x288xf32>
    %c2_59 = arith.constant 2 : index
    %c0_60 = arith.constant 0 : index
    %c0_61 = arith.constant 0 : index
    %69 = vector.load %arg7[%c2_59, %c0_60, %c0_61] : memref<3x288x256xf32, #tpu.memory_space<vmem>>, vector<1x288x256xf32>
    %70 = vector.shape_cast %69 : vector<1x288x256xf32> to vector<288x256xf32>
    %cst_62 = arith.constant dense<0.000000e+00> : vector<32x256xf32>
    %71 = tpu.matmul %68, %70, %cst_62 {dimension_numbers = #tpu.dot_dimension_numbers<[1], [0], [0], [1], [0, 0, 1, 1], [], []>} : vector<32x288xf32>, vector<288x256xf32>, vector<32x256xf32> -> vector<32x256xf32>
    %72 = arith.addf %66, %71 : vector<32x256xf32>
    %c0_63 = arith.constant 0 : index
    %c0_64 = arith.constant 0 : index
    %73 = vector.load %arg8[%c0_63, %c0_64] : memref<1x256xf32, #tpu.memory_space<vmem>>, vector<1x256xf32>
    %74 = vector.broadcast %73 : vector<1x256xf32> to vector<32x256xf32>
    %75 = arith.addf %72, %74 : vector<32x256xf32>
    %c0_65 = arith.constant 0 : index
    %c0_66 = arith.constant 0 : index
    %76 = vector.load %arg11[%c0_65, %c0_66] : memref<256x16xf32, #tpu.memory_space<vmem>>, vector<256x16xf32>
    %c0_67 = arith.constant 0 : index
    %c0_68 = arith.constant 0 : index
    %77 = vector.load %arg9[%c0_67, %c0_68] : memref<1x256xf32, #tpu.memory_space<vmem>>, vector<1x256xf32>
    %c0_69 = arith.constant 0 : index
    %c0_70 = arith.constant 0 : index
    %78 = vector.load %arg10[%c0_69, %c0_70] : memref<1x256xf32, #tpu.memory_space<vmem>>, vector<1x256xf32>
    %cst_71 = arith.constant dense<0.000000e+00> : vector<256xf32>
    %79 = vector.multi_reduction <add>, %75, %cst_71 [0] : vector<32x256xf32> to vector<256xf32>
    %80 = vector.shape_cast %79 : vector<256xf32> to vector<1x256xf32>
    %cst_72 = arith.constant dense<0.000000e+00> : vector<1x16xf32>
    %81 = tpu.matmul %80, %76, %cst_72 {dimension_numbers = #tpu.dot_dimension_numbers<[1], [0], [0], [1], [0, 0, 1, 1], [], []>} : vector<1x256xf32>, vector<256x16xf32>, vector<1x16xf32> -> vector<1x16xf32>
    %cst_73 = arith.constant 0.001953125 : f32
    %82 = vector.broadcast %cst_73 : f32 to vector<1x16xf32>
    %83 = arith.mulf %81, %82 : vector<1x16xf32>
    %84 = tpu.concatenate %83, %83, %83, %83, %83, %83, %83, %83, %83, %83, %83, %83, %83, %83, %83, %83 in 1 : vector<1x16xf32>, vector<1x16xf32>, vector<1x16xf32>, vector<1x16xf32>, vector<1x16xf32>, vector<1x16xf32>, vector<1x16xf32>, vector<1x16xf32>, vector<1x16xf32>, vector<1x16xf32>, vector<1x16xf32>, vector<1x16xf32>, vector<1x16xf32>, vector<1x16xf32>, vector<1x16xf32>, vector<1x16xf32> -> vector<1x256xf32>
    %85 = vector.broadcast %84 : vector<1x256xf32> to vector<32x256xf32>
    %86 = arith.subf %75, %85 : vector<32x256xf32>
    %87 = arith.mulf %86, %86 : vector<32x256xf32>
    %cst_74 = arith.constant dense<0.000000e+00> : vector<256xf32>
    %88 = vector.multi_reduction <add>, %87, %cst_74 [0] : vector<32x256xf32> to vector<256xf32>
    %89 = vector.shape_cast %88 : vector<256xf32> to vector<1x256xf32>
    %cst_75 = arith.constant dense<0.000000e+00> : vector<1x16xf32>
    %90 = tpu.matmul %89, %76, %cst_75 {dimension_numbers = #tpu.dot_dimension_numbers<[1], [0], [0], [1], [0, 0, 1, 1], [], []>} : vector<1x256xf32>, vector<256x16xf32>, vector<1x16xf32> -> vector<1x16xf32>
    %cst_76 = arith.constant 0.001953125 : f32
    %91 = vector.broadcast %cst_76 : f32 to vector<1x16xf32>
    %92 = arith.mulf %90, %91 : vector<1x16xf32>
    %cst_77 = arith.constant 9.99999974E-6 : f32
    %93 = vector.broadcast %cst_77 : f32 to vector<1x16xf32>
    %94 = arith.addf %92, %93 : vector<1x16xf32>
    %95 = math.rsqrt %94 : vector<1x16xf32>
    %96 = tpu.concatenate %95, %95, %95, %95, %95, %95, %95, %95, %95, %95, %95, %95, %95, %95, %95, %95 in 1 : vector<1x16xf32>, vector<1x16xf32>, vector<1x16xf32>, vector<1x16xf32>, vector<1x16xf32>, vector<1x16xf32>, vector<1x16xf32>, vector<1x16xf32>, vector<1x16xf32>, vector<1x16xf32>, vector<1x16xf32>, vector<1x16xf32>, vector<1x16xf32>, vector<1x16xf32>, vector<1x16xf32>, vector<1x16xf32> -> vector<1x256xf32>
    %97 = arith.mulf %77, %96 : vector<1x256xf32>
    %98 = vector.broadcast %97 : vector<1x256xf32> to vector<32x256xf32>
    %99 = arith.mulf %86, %98 : vector<32x256xf32>
    %100 = vector.broadcast %78 : vector<1x256xf32> to vector<32x256xf32>
    %101 = arith.addf %99, %100 : vector<32x256xf32>
    %cst_78 = arith.constant 0.000000e+00 : f32
    %102 = vector.broadcast %cst_78 : f32 to vector<32x256xf32>
    %103 = arith.maximumf %101, %102 : vector<32x256xf32>
    %104 = vector.shape_cast %103 : vector<32x256xf32> to vector<2x16x256xf32>
    %c0_79 = arith.constant 0 : index
    %c0_80 = arith.constant 0 : index
    %c0_81 = arith.constant 0 : index
    %105 = vector.load %arg12[%c0_79, %c0_80, %c0_81] : memref<2x16x256xf32, #tpu.memory_space<vmem>>, vector<2x16x256xf32>
    tpu.vector_store %arg12[%c0_79, %c0_80, %c0_81], %104 {strides = array<i32>} : memref<2x16x256xf32, #tpu.memory_space<vmem>>, vector<2x16x256xf32>,
    return
  }
  func.func @transform_0(%arg0: i32) -> (i32, i32, i32) {
    %c0_i32 = arith.constant 0 : i32
    %c0_i32_0 = arith.constant 0 : i32
    %c0_i32_1 = arith.constant 0 : i32
    %c0_i32_2 = arith.constant 0 : i32
    return %c0_i32, %c0_i32_0, %c0_i32_1 : i32, i32, i32
  }
  func.func @transform_1(%arg0: i32) -> (i32, i32, i32) {
    %c0_i32 = arith.constant 0 : i32
    %c0_i32_0 = arith.constant 0 : i32
    %c0_i32_1 = arith.constant 0 : i32
    %c0_i32_2 = arith.constant 0 : i32
    return %c0_i32, %c0_i32_0, %c0_i32_1 : i32, i32, i32
  }
  func.func @transform_2(%arg0: i32) -> (i32, i32) {
    %c0_i32 = arith.constant 0 : i32
    %c0_i32_0 = arith.constant 0 : i32
    %c0_i32_1 = arith.constant 0 : i32
    return %c0_i32, %c0_i32_0 : i32, i32
  }
  func.func @transform_3(%arg0: i32) -> (i32, i32) {
    %c0_i32 = arith.constant 0 : i32
    %c0_i32_0 = arith.constant 0 : i32
    %c0_i32_1 = arith.constant 0 : i32
    return %c0_i32, %c0_i32_0 : i32, i32
  }
  func.func @transform_4(%arg0: i32) -> (i32, i32) {
    %c0_i32 = arith.constant 0 : i32
    %c0_i32_0 = arith.constant 0 : i32
    %c0_i32_1 = arith.constant 0 : i32
    return %c0_i32, %c0_i32_0 : i32, i32
  }
  func.func @transform_5(%arg0: i32) -> (i32, i32) {
    %c0_i32 = arith.constant 0 : i32
    %c0_i32_0 = arith.constant 0 : i32
    %c0_i32_1 = arith.constant 0 : i32
    return %c0_i32, %c0_i32_0 : i32, i32
  }
  func.func @transform_6(%arg0: i32) -> (i32, i32, i32) {
    %c0_i32 = arith.constant 0 : i32
    %c0_i32_0 = arith.constant 0 : i32
    %c0_i32_1 = arith.constant 0 : i32
    %c0_i32_2 = arith.constant 0 : i32
    return %c0_i32, %c0_i32_0, %c0_i32_1 : i32, i32, i32
  }
  func.func @transform_7(%arg0: i32) -> (i32, i32) {
    %c0_i32 = arith.constant 0 : i32
    %c0_i32_0 = arith.constant 0 : i32
    %c0_i32_1 = arith.constant 0 : i32
    return %c0_i32, %c0_i32_0 : i32, i32
  }
  func.func @transform_8(%arg0: i32) -> (i32, i32) {
    %c0_i32 = arith.constant 0 : i32
    %c0_i32_0 = arith.constant 0 : i32
    %c0_i32_1 = arith.constant 0 : i32
    return %c0_i32, %c0_i32_0 : i32, i32
  }
  func.func @transform_9(%arg0: i32) -> (i32, i32) {
    %c0_i32 = arith.constant 0 : i32
    %c0_i32_0 = arith.constant 0 : i32
    %c0_i32_1 = arith.constant 0 : i32
    return %c0_i32, %c0_i32_0 : i32, i32
  }
  func.func @transform_10(%arg0: i32) -> (i32, i32) {
    %c0_i32 = arith.constant 0 : i32
    %c0_i32_0 = arith.constant 0 : i32
    %c0_i32_1 = arith.constant 0 : i32
    return %c0_i32, %c0_i32_0 : i32, i32
  }
  func.func @transform_11(%arg0: i32) -> (i32, i32, i32) {
    %c0_i32 = arith.constant 0 : i32
    %c0_i32_0 = arith.constant 0 : i32
    %c0_i32_1 = arith.constant 0 : i32
    %c0_i32_2 = arith.constant 0 : i32
    return %c0_i32, %c0_i32_0, %c0_i32_1 : i32, i32, i32
  }
}

</mosaic_0001>

<bundles_post_ra>
// kernel: double_conv_forward.1
= control target key start
LH: loop header
LB: loop body
LE: loop exit
PB: predicated region body
PF: predicated region fallthrough
CT: control target
= control target key end

     0   :  { %v2542_v3 = vmov 0.0   ;;  %vm83_vm0 = vcmask 588800   ;;  %vm585_vm1 = vcmask 261120   ;;  %s2544_s17 = smov 16   ;;  %s2545_s18 = smov 64   ;;  %vm583_vm2 = vcmask 130048   ;;  %s4213_s1 = inlined_call_operand.vmem [shape: f32[3,72,256], index: 1, kind: input, shape index: {}]   ;;  %s4214_s0 = inlined_call_operand.vmem [shape: f32[2,18,72], index: 0, kind: input, shape index: {}]   ;;  %s4215_s5 = inlined_call_operand.vmem [shape: f32[256,16], index: 5, kind: input, shape index: {}, may-alias: {5,10}]   ;;  %s4216_s2 = inlined_call_operand.vmem [shape: f32[1,256], index: 2, kind: input, shape index: {}]   ;;  %s4217_s6 = inlined_call_operand.vmem [shape: f32[3,288,256], index: 6, kind: input, shape index: {}]   ;;  %s4218_s3 = inlined_call_operand.vmem [shape: f32[1,256], index: 3, kind: input, shape index: {}]   ;;  %s4219_s4 = inlined_call_operand.vmem [shape: f32[1,256], index: 4, kind: input, shape index: {}]   ;;  %s4220_s10 = inlined_call_operand.vmem [shape: f32[256,16], index: 10, kind: input, shape index: {}, may-alias: {5,10}]   ;;  %s4221_s7 = inlined_call_operand.vmem [shape: f32[1,256], index: 7, kind: input, shape index: {}]   ;;  %s4222_s8 = inlined_call_operand.vmem [shape: f32[1,256], index: 8, kind: input, shape index: {}]   ;;  %s4223_s9 = inlined_call_operand.vmem [shape: f32[1,256], index: 9, kind: input, shape index: {}]   ;;  %s4224_s11 = inlined_call_operand.vmem [shape: f32[2,16,256], index: 11, kind: output, shape index: {}]  }
   0x1   :  { %v2200_v0 = vld [vmem:[%s4213_s1 + $0x118] sm:$0xff]  ;;  %v59_v1 = vld [vmem:[%s4213_s1 + $0x88] sm:$0xff]  ;;  %v2199_v2 = vld [vmem:[%s4213_s1 + $0x110] sm:$0xff]  ;;  %160 = vmatprep.mubr.f32.mxu0 %v2542_v3  ;;  %801 = vst [vmem:[#allocation2] sm:$0xff] %v2542_v3  ;;  %261 = vmatprep.mubr.f32.mxu1 %v2542_v3  ;;  %s2546_s19 = smov 32   ;;  %s2547_s20 = smov 96  }
   0x2   :  { %802 = vst [vmem:[#allocation2 + $0x8] sm:$0xff] %v2542_v3  ;;  %807 = vst [vmem:[#allocation2 + $0x30] sm:$0x3] %v2542_v3  ;;  %110 = vmatprep.subr.mxu0 %v2200_v0  ;;  %211 = vmatprep.subr.mxu1 %v59_v1  ;;  %v58_v4 = vld [vmem:[%s4213_s1 + $0x80] sm:$0xff]  ;;  %v2198_v5 = vld [vmem:[%s4213_s1 + $0x108] sm:$0xff]  ;;  %s2549_s21 = smov 112  }
   0x3   :  { %808 = vst [vmem:[#allocation2 + $0x38] sm:$0x3] %v2542_v3  ;;  %811 = vst [vmem:[#allocation2 + $0x48] sm:$0xff] %v2542_v3  ;;  %v57_v6 = vld [vmem:[%s4213_s1 + $0x78] sm:$0xff]  ;;  %111 = vmatpush1.msra.mxu0 %v2199_v2  ;;  %212 = vmatpush1.msra.mxu1 %v58_v4  ;;  %v2197_v7 = vld [vmem:[%s4213_s1 + $0x100] sm:$0xff]  ;;  %vm587_vm3 = vcmask 392192  }
   0x4   :  { %812 = vst [vmem:[#allocation2 + $0x50] sm:$0xff] %v2542_v3  ;;  %817 = vst [vmem:[#allocation2 + $0x78] sm:$0x3] %v2542_v3  ;;  %v56_v8 = vld [vmem:[%s4213_s1 + $0x70] sm:$0xff]  ;;  %v2196_v9 = vld [vmem:[%s4213_s1 + $0xf8] sm:$0xff]  ;;  %112 = vmatprep.subr.mxu0 %v2198_v5  ;;  %213 = vmatprep.subr.mxu1 %v57_v6  ;;  %vm589_vm4 = vcmask 523264  }
   0x5   :  { %818 = vst [vmem:[#allocation2 + $0x80] sm:$0x3] %v2542_v3  ;;  %v55_v10 = vld [vmem:[%s4213_s1 + $0x68] sm:$0xff]  ;;  %v2195_v11 = vld [vmem:[%s4213_s1 + $0xf0] sm:$0xff]  ;;  %v54_v12 = vld [vmem:[%s4213_s1 + $0x60] sm:$0xff]  ;;  %113 = vmatpush1.msra.mxu0 %v2197_v7  ;;  %214 = vmatpush1.msra.mxu1 %v56_v8  ;;  %vm591_vm5 = vcmask 654336  }
   0x6   :  { %v2194_v13 = vld [vmem:[%s4213_s1 + $0xe8] sm:$0xff]  ;;  %v53_v14 = vld [vmem:[%s4213_s1 + $0x58] sm:$0xff]  ;;  %114 = vmatprep.subr.mxu0 %v2196_v9  ;;  %215 = vmatprep.subr.mxu1 %v55_v10  ;;  %v2193_v15 = vld [vmem:[%s4213_s1 + $0xe0] sm:$0xff]  ;;  %803 = vst.msk [vmem:[#allocation2 + $0x10] sm:$0xff] %vm585_vm1, %v2542_v3  ;;  %vm593_vm6 = vcmask 785408   ;;  %vm595_vm7 = vcmask 916480  }
   0x7   :  { %v52_v16 = vld [vmem:[%s4213_s1 + $0x50] sm:$0xff]  ;;  %115 = vmatpush1.msra.mxu0 %v2195_v11  ;;  %216 = vmatpush1.msra.mxu1 %v54_v12  ;;  %v2192_v17 = vld [vmem:[%s4213_s1 + $0xd8] sm:$0xff]  ;;  %v51_v18 = vld [vmem:[%s4213_s1 + $0x48] sm:$0xff]  ;;  %806 = vst.msk [vmem:[#allocation2 + $0x28] sm:$0xff] %vm585_vm1, %v2542_v3  ;;  %vm979_vm8 = vcmask 1046528   ;;  %vm809_vm9 = vcmask 254976  }
   0x8   :  { %116 = vmatprep.subr.mxu0 %v2194_v13  ;;  %217 = vmatprep.subr.mxu1 %v53_v14  ;;  %v2191_v19 = vld [vmem:[%s4213_s1 + $0xd0] sm:$0xff]  ;;  %v50_v20 = vld [vmem:[%s4213_s1 + $0x40] sm:$0xff]  ;;  %v2190_v21 = vld [vmem:[%s4213_s1 + $0xc8] sm:$0xff]  ;;  %813 = vst.msk [vmem:[#allocation2 + $0x58] sm:$0xff] %vm585_vm1, %v2542_v3  ;;  %vm828_vm10 = vcmask 1040384   ;;  %vm1489_vm11 = vcmask 1045504  }
   0x9   :  { %117 = vmatpush1.msra.mxu0 %v2193_v15  ;;  %218 = vmatpush1.msra.mxu1 %v52_v16  ;;  %v49_v22 = vld [vmem:[%s4213_s1 + $0x38] sm:$0xff]  ;;  %v2189_v23 = vld [vmem:[%s4213_s1 + $0xc0] sm:$0xff]  ;;  %v48_v24 = vld [vmem:[%s4213_s1 + $0x30] sm:$0xff]  ;;  %816 = vst.msk [vmem:[#allocation2 + $0x70] sm:$0xff] %vm585_vm1, %v2542_v3 }
   0xa   :  { %118 = vmatprep.subr.mxu0 %v2192_v17  ;;  %219 = vmatprep.subr.mxu1 %v51_v18  ;;  %v2188_v25 = vld [vmem:[%s4213_s1 + $0xb8] sm:$0xff]  ;;  %v47_v26 = vld [vmem:[%s4213_s1 + $0x28] sm:$0xff]  ;;  %v2187_v27 = vld [vmem:[%s4213_s1 + $0xb0] sm:$0xff] }
   0xb   :  { %119 = vmatpush1.msra.mxu0 %v2191_v19  ;;  %220 = vmatpush1.msra.mxu1 %v50_v20  ;;  %v46_v28 = vld [vmem:[%s4213_s1 + $0x20] sm:$0xff]  ;;  %v2186_v29 = vld [vmem:[%s4213_s1 + $0xa8] sm:$0xff]  ;;  %v45_v30 = vld [vmem:[%s4213_s1 + $0x18] sm:$0xff] }
   0xc   :  { %120 = vmatprep.subr.mxu0 %v2190_v21  ;;  %221 = vmatprep.subr.mxu1 %v49_v22  ;;  %v2185_v31 = vld [vmem:[%s4213_s1 + $0xa0] sm:$0xff]  ;;  %v44_v32 = vld [vmem:[%s4213_s1 + $0x10] sm:$0xff]  ;;  %v2184_v33 = vld [vmem:[%s4213_s1 + $0x98] sm:$0xff] }
   0xd   :  { %121 = vmatpush1.msra.mxu0 %v2189_v23  ;;  %222 = vmatpush1.msra.mxu1 %v48_v24  ;;  %v43_v34 = vld [vmem:[%s4213_s1 + $0x8] sm:$0xff]  ;;  %v2183_v35 = vld [vmem:[%s4213_s1 + $0x90] sm:$0xff]  ;;  %v42_v36 = vld [vmem:[%s4213_s1] sm:$0xff] }
   0xe   :  { %122 = vmatprep.subr.mxu0 %v2188_v25  ;;  %223 = vmatprep.subr.mxu1 %v47_v26  ;;  %v60_v37 = vld [vmem:[%s4214_s0 + $0x1] sm:$0xff]  ;;  %v2224_v41 = vld [vmem:[%s4213_s1 + $0x198] sm:$0xff]  ;;  %v2223_v42 = vld [vmem:[%s4213_s1 + $0x190] sm:$0xff] }
   0xf   :  { %123 = vmatpush1.msra.mxu0 %v2187_v27  ;;  %224 = vmatpush1.msra.mxu1 %v46_v28  ;;  %v38_v38 = vld [vmem:[%s4214_s0] sm:$0xff]  ;;  %v2226_v39 = vld [vmem:[%s4213_s1 + $0x1a8] sm:$0xff]  ;;  %v2220_v47 = vld [vmem:[%s4213_s1 + $0x178] sm:$0xff] }
  0x10   :  { %124 = vmatprep.subr.mxu0 %v2186_v29  ;;  %225 = vmatprep.subr.mxu1 %v45_v30  ;;  %v2225_v40 = vld [vmem:[%s4213_s1 + $0x1a0] sm:$0xff]  ;;  %v39_v43 = vld [vmem:[%s4214_s0 + $0x8] sm:$0xff]  ;;  %v2219_v48 = vld [vmem:[%s4213_s1 + $0x170] sm:$0xff] }
  0x11   :  { %125 = vmatpush1.msra.mxu0 %v2185_v31  ;;  %226 = vmatpush1.msra.mxu1 %v44_v32  ;;  %v61_v44 = vld [vmem:[%s4214_s0 + $0x9] sm:$0xff]  ;;  %v2221_v46 = vld [vmem:[%s4213_s1 + $0x180] sm:$0xff]  ;;  %v40_v49 = vld [vmem:[%s4214_s0 + $0x18] sm:$0xff] }
  0x12   :  { %126 = vmatprep.subr.mxu0 %v2184_v33  ;;  %227 = vmatprep.subr.mxu1 %v43_v34  ;;  %v2222_v45 = vld [vmem:[%s4213_s1 + $0x188] sm:$0xff]  ;;  %v62_v50 = vld [vmem:[%s4214_s0 + $0x19] sm:$0xff]  ;;  %v2215_v54 = vld [vmem:[%s4213_s1 + $0x150] sm:$0xff] }
  0x13   :  { %127 = vmatpush1.msra.mxu0 %v2183_v35  ;;  %228 = vmatpush1.msra.mxu1 %v42_v36  ;;  %v2218_v51 = vld [vmem:[%s4213_s1 + $0x168] sm:$0xff]  ;;  %v2217_v52 = vld [vmem:[%s4213_s1 + $0x160] sm:$0xff]  ;;  %v2216_v53 = vld [vmem:[%s4213_s1 + $0x158] sm:$0xff] }
  0x14   :  { %2201 = vmatmul.mubr.msk.f32.vlgmr.msra.gmra.mxu0 %vm83_vm0, %v60_v37  ;;  %2205 = vmatmul.mubr.msk.f32.vlgmr.msra.gmra.mxu1 %vm83_vm0, %v38_v38  ;;  %v41_v55 = vld [vmem:[%s4214_s0 + $0x20] sm:$0xff]  ;;  %v2214_v57 = vld [vmem:[%s4213_s1 + $0x148] sm:$0xff]  ;;  %v2212_v59 = vld [vmem:[%s4213_s1 + $0x138] sm:$0xff] }
  0x15   :  { %335 = vmatprep.subr.mxu0 %v2226_v39  ;;  %166 = vmatprep.mubr.f32.mxu0 %v2542_v3  ;;  %v63_v56 = vld [vmem:[%s4214_s0 + $0x21] sm:$0xff]  ;;  %v2211_v60 = vld [vmem:[%s4213_s1 + $0x130] sm:$0xff]  ;;  %v469_v4 = vld [vmem:[%s4215_s5 + $0xf8] sm:$0xff] }
  0x16   :  { %336 = vmatpush1.msra.mxu0 %v2225_v40  ;;  %267 = vmatprep.mubr.f32.mxu1 %v2542_v3  ;;  %v2213_v58 = vld [vmem:[%s4213_s1 + $0x140] sm:$0xff]  ;;  %v2210_v61 = vld [vmem:[%s4213_s1 + $0x128] sm:$0xff]  ;;  %v453_v5 = vld [vmem:[%s4215_s5 + $0x78] sm:$0xff] }
  0x17   :  { %337 = vmatprep.subr.mxu0 %v2224_v41  ;;  %v2209_v62 = vld [vmem:[%s4213_s1 + $0x120] sm:$0xff]  ;;  %v287_v0 = vld [vmem:[%s4214_s0 + $0xa] sm:$0xff]  ;;  %2387 = vmatprep.subr.mxu1 %v469_v4  ;;  %v465_v12 = vld [vmem:[%s4215_s5 + $0xd8] sm:$0xff] }
  0x18   :  { %338 = vmatpush1.msra.mxu0 %v2223_v42  ;;  %2206 = vmatmul.mubr.msk.f32.gmra.mxu1 %vm83_vm0, %v39_v43  ;;  %v286_v63 = vld [vmem:[%s4214_s0 + $0x2] sm:$0xff]  ;;  %v288_v1 = vld [vmem:[%s4214_s0 + $0x1a] sm:$0xff]  ;;  %v468_v6 = vld [vmem:[%s4215_s5 + $0xf0] sm:$0xff] }
  0x19   :  { %2202 = vmatmul.mubr.msk.f32.gmra.mxu0 %vm83_vm0, %v61_v44  ;;  %339 = vmatprep.subr.mxu0 %v2222_v45  ;;  %v289_v2 = vld [vmem:[%s4214_s0 + $0x22] sm:$0xff]  ;;  %v452_v7 = vld [vmem:[%s4215_s5 + $0x70] sm:$0xff]  ;;  %v449_v13 = vld [vmem:[%s4215_s5 + $0x58] sm:$0xff]  ;;  %s2548_s0 = smov 80  }
  0x1a   :  { %340 = vmatpush1.msra.mxu0 %v2221_v46  ;;  %172 = vmatprep.mubr.f32.mxu0 %v2542_v3  ;;  %v467_v8 = vld [vmem:[%s4215_s5 + $0xe8] sm:$0xff]  ;;  %v466_v10 = vld [vmem:[%s4215_s5 + $0xe0] sm:$0xff]  ;;  %v464_v14 = vld [vmem:[%s4215_s5 + $0xd0] sm:$0xff] }
  0x1b   :  { %341 = vmatprep.subr.mxu0 %v2220_v47  ;;  %273 = vmatprep.mubr.f32.mxu1 %v2542_v3  ;;  %v451_v9 = vld [vmem:[%s4215_s5 + $0x68] sm:$0xff]  ;;  %v450_v11 = vld [vmem:[%s4215_s5 + $0x60] sm:$0xff]  ;;  %v448_v15 = vld [vmem:[%s4215_s5 + $0x50] sm:$0xff]  ;;  %v420_v47 = vlaneseq }
  0x1c   :  { %342 = vmatpush1.msra.mxu0 %v2219_v48  ;;  %2207 = vmatmul.mubr.msk.f32.gmra.mxu1 %vm83_vm0, %v40_v49  ;;  %v463_v16 = vld [vmem:[%s4215_s5 + $0xc8] sm:$0xff]  ;;  %v462_v18 = vld [vmem:[%s4215_s5 + $0xc0] sm:$0xff]  ;;  %v461_v20 = vld [vmem:[%s4215_s5 + $0xb8] sm:$0xff] }
  0x1d   :  { %2203 = vmatmul.mubr.msk.f32.gmra.mxu0 %vm83_vm0, %v62_v50  ;;  %343 = vmatprep.subr.mxu0 %v2218_v51  ;;  %v447_v17 = vld [vmem:[%s4215_s5 + $0x48] sm:$0xff]  ;;  %v446_v19 = vld [vmem:[%s4215_s5 + $0x40] sm:$0xff]  ;;  %v445_v21 = vld [vmem:[%s4215_s5 + $0x38] sm:$0xff]  ;;  %v2937_v50 = vshrl.u32 %v420_v47, 7 }
  0x1e   :  { %344 = vmatpush1.msra.mxu0 %v2217_v52  ;;  %178 = vmatprep.mubr.f32.mxu0 %v2542_v3  ;;  %v460_v22 = vld [vmem:[%s4215_s5 + $0xb0] sm:$0xff]  ;;  %v459_v24 = vld [vmem:[%s4215_s5 + $0xa8] sm:$0xff]  ;;  %v458_v26 = vld [vmem:[%s4215_s5 + $0xa0] sm:$0xff] }
  0x1f   :  { %345 = vmatprep.subr.mxu0 %v2216_v53  ;;  %279 = vmatprep.mubr.f32.mxu1 %v2542_v3  ;;  %v444_v23 = vld [vmem:[%s4215_s5 + $0x30] sm:$0xff]  ;;  %v443_v25 = vld [vmem:[%s4215_s5 + $0x28] sm:$0xff]  ;;  %v442_v27 = vld [vmem:[%s4215_s5 + $0x20] sm:$0xff]  ;;  %v2940_v53 = vsub.s32 0, %v2937_v50 }
  0x20   :  { %346 = vmatpush1.msra.mxu0 %v2215_v54  ;;  %2208 = vmatmul.mubr.msk.f32.gmra.mxu1 %vm83_vm0, %v41_v55  ;;  %v457_v28 = vld [vmem:[%s4215_s5 + $0x98] sm:$0xff]  ;;  %v456_v30 = vld [vmem:[%s4215_s5 + $0x90] sm:$0xff]  ;;  %v455_v32 = vld [vmem:[%s4215_s5 + $0x88] sm:$0xff] }
  0x21   :  { %2204 = vmatmul.mubr.msk.f32.gmra.mxu0 %vm83_vm0, %v63_v56  ;;  %347 = vmatprep.subr.mxu0 %v2214_v57  ;;  %v441_v29 = vld [vmem:[%s4215_s5 + $0x18] sm:$0xff]  ;;  %v440_v31 = vld [vmem:[%s4215_s5 + $0x10] sm:$0xff]  ;;  %v439_v33 = vld [vmem:[%s4215_s5 + $0x8] sm:$0xff]  ;;  %v2946_v57 = vsub.s32 1, %v2937_v50 }
  0x22   :  { %348 = vmatpush1.msra.mxu0 %v2213_v58  ;;  %385 = vmatprep.mubr.f32.mxu0 %v2542_v3  ;;  %v454_v34 = vld [vmem:[%s4215_s5 + $0x80] sm:$0xff] }
  0x23   :  { %349 = vmatprep.subr.mxu0 %v2212_v59  ;;  %2388 = vmatpush3.msra.mxu1 %v453_v5  ;;  %v438_v35 = vld [vmem:[%s4215_s5] sm:$0xff] }
  0x24   :  { %350 = vmatpush1.msra.mxu0 %v2211_v60  ;;  %2389 = vmatprep.subr.mxu1 %v468_v6  ;;  %v418_v56 = vld [vmem:[%s4216_s2] sm:$0x3]  ;;  %s2543_s2 = smov 48  }
  0x25   :  { %351 = vmatprep.subr.mxu0 %v2210_v61  ;;  %2390 = vmatpush3.msra.mxu1 %v452_v7 }
  0x26   :  { %352 = vmatpush1.msra.mxu0 %v2209_v62  ;;  %2391 = vmatprep.subr.mxu1 %v467_v8 }
  0x27   :  { %2227 = vmatmul.mubr.msk.f32.vlgmr.msra.gmra.mxu0 %vm83_vm0, %v286_v63  ;;  %2422 = vmatprep.subr.mxu0 %v469_v4  ;;  %v423_v63 = vrot.slane %v418_v56, %v2940_v53 }
  0x28   :  { %391 = vmatprep.mubr.f32.mxu0 %v2542_v3  ;;  %2423 = vmatpush3.msra.mxu0 %v453_v5 }
  0x29   :  { %2424 = vmatprep.subr.mxu0 %v468_v6  ;;  %2392 = vmatpush3.msra.mxu1 %v451_v9  ;;  %v427_v6 = vrot.slane %v418_v56, %v2946_v57 }
  0x2a   :  { %2425 = vmatpush3.msra.mxu0 %v452_v7  ;;  %2393 = vmatprep.subr.mxu1 %v466_v10 }
  0x2b   :  { %2228 = vmatmul.mubr.msk.f32.gmra.mxu0 %vm83_vm0, %v287_v0  ;;  %2426 = vmatprep.subr.mxu0 %v467_v8 }
  0x2c   :  { %397 = vmatprep.mubr.f32.mxu0 %v2542_v3  ;;  %2427 = vmatpush3.msra.mxu0 %v451_v9 }
  0x2d   :  { %2428 = vmatprep.subr.mxu0 %v466_v10  ;;  %2394 = vmatpush3.msra.mxu1 %v450_v11 }
  0x2e   :  { %2429 = vmatpush3.msra.mxu0 %v450_v11  ;;  %2395 = vmatprep.subr.mxu1 %v465_v12 }
  0x2f   :  { %2229 = vmatmul.mubr.msk.f32.gmra.mxu0 %vm83_vm0, %v288_v1  ;;  %2430 = vmatprep.subr.mxu0 %v465_v12 }
  0x30   :  { %403 = vmatprep.mubr.f32.mxu0 %v2542_v3  ;;  %2396 = vmatpush3.msra.mxu1 %v449_v13 }
  0x31   :  { %2431 = vmatpush3.msra.mxu0 %v449_v13  ;;  %2397 = vmatprep.subr.mxu1 %v464_v14 }
  0x32   :  { %2432 = vmatprep.subr.mxu0 %v464_v14  ;;  %2398 = vmatpush3.msra.mxu1 %v448_v15 }
  0x33   :  { %2230 = vmatmul.mubr.msk.f32.gmra.mxu0 %vm83_vm0, %v289_v2  ;;  %2399 = vmatprep.subr.mxu1 %v463_v16 }
  0x34   :  { %2433 = vmatpush3.msra.mxu0 %v448_v15  ;;  %2400 = vmatpush3.msra.mxu1 %v447_v17 }
  0x35   :  { %2434 = vmatprep.subr.mxu0 %v463_v16  ;;  %2401 = vmatprep.subr.mxu1 %v462_v18 }
  0x36   :  { %2435 = vmatpush3.msra.mxu0 %v447_v17  ;;  %2402 = vmatpush3.msra.mxu1 %v446_v19 }
  0x37   :  { %2436 = vmatprep.subr.mxu0 %v462_v18  ;;  %2403 = vmatprep.subr.mxu1 %v461_v20 }
  0x38   :  { %2437 = vmatpush3.msra.mxu0 %v446_v19  ;;  %2404 = vmatpush3.msra.mxu1 %v445_v21 }
  0x39   :  { %2438 = vmatprep.subr.mxu0 %v461_v20  ;;  %2405 = vmatprep.subr.mxu1 %v460_v22 }
  0x3a   :  { %2439 = vmatpush3.msra.mxu0 %v445_v21  ;;  %2406 = vmatpush3.msra.mxu1 %v444_v23 }
  0x3b   :  { %2440 = vmatprep.subr.mxu0 %v460_v22  ;;  %2407 = vmatprep.subr.mxu1 %v459_v24 }
  0x3c   :  { %2441 = vmatpush3.msra.mxu0 %v444_v23  ;;  %2408 = vmatpush3.msra.mxu1 %v443_v25 }
  0x3d   :  { %2442 = vmatprep.subr.mxu0 %v459_v24  ;;  %2409 = vmatprep.subr.mxu1 %v458_v26 }
  0x3e   :  { %2443 = vmatpush3.msra.mxu0 %v443_v25  ;;  %2410 = vmatpush3.msra.mxu1 %v442_v27 }
  0x3f   :  { %2444 = vmatprep.subr.mxu0 %v458_v26  ;;  %2411 = vmatprep.subr.mxu1 %v457_v28 }
  0x40   :  { %2445 = vmatpush3.msra.mxu0 %v442_v27  ;;  %2412 = vmatpush3.msra.mxu1 %v441_v29 }
  0x41   :  { %2446 = vmatprep.subr.mxu0 %v457_v28  ;;  %2413 = vmatprep.subr.mxu1 %v456_v30 }
  0x42   :  { %2447 = vmatpush3.msra.mxu0 %v441_v29  ;;  %2414 = vmatpush3.msra.mxu1 %v440_v31 }
  0x43   :  { %2448 = vmatprep.subr.mxu0 %v456_v30  ;;  %2415 = vmatprep.subr.mxu1 %v455_v32 }
  0x44   :  { %2449 = vmatpush3.msra.mxu0 %v440_v31  ;;  %2416 = vmatpush3.msra.mxu1 %v439_v33 }
  0x45   :  { %2450 = vmatprep.subr.mxu0 %v455_v32  ;;  %2417 = vmatprep.subr.mxu1 %v454_v34 }
  0x46   :  { %2451 = vmatpush3.msra.mxu0 %v439_v33  ;;  %2418 = vmatpush3.msra.mxu1 %v438_v35 }
  0x47   :  { %2452 = vmatprep.subr.mxu0 %v454_v34 }
  0x48   :  { %2453 = vmatpush3.msra.mxu0 %v438_v35 }
  0xd4   :  { %v162_v36 = vpop.f32.mrf.mxu0  ;;  %v263_v37 = vpop.f32.mrf.mxu1 }
  0xd5   :  { %v264_v59 = vadd.f32 %v263_v37, %v162_v36 }
  0xd6   :  { %v164_v38 = vpop.f32.mrf.mxu0  ;;  %v265_v39 = vpop.f32.mrf.mxu1 }
  0xd7   :  { %v266_v1 = vadd.f32 %v265_v39, %v164_v38 }
  0xd8   :  { %v269_v42 = vpop.f32.mrf.mxu1 }
  0xd9   :  { %v168_v40 = vpop.f32.mrf.mxu0 }
  0xda   :  { %v271_v45 = vpop.f32.mrf.mxu1  ;;  %v270_v55 = vadd.f32 %v269_v42, %v168_v40 }
  0xdb   :  { %v170_v41 = vpop.f32.mrf.mxu0 }
  0xdc   :  { %v275_v48 = vpop.f32.mrf.mxu1  ;;  %v272_v60 = vadd.f32 %v271_v45, %v170_v41 }
  0xdd   :  { %v174_v43 = vpop.f32.mrf.mxu0 }
  0xde   :  { %v277_v52 = vpop.f32.mrf.mxu1  ;;  %v276_v2 = vadd.f32 %v275_v48, %v174_v43 }
  0xdf   :  { %v176_v44 = vpop.f32.mrf.mxu0 }
  0xe0   :  { %v281_v61 = vpop.f32.mrf.mxu1  ;;  %v278_v8 = vadd.f32 %v277_v52, %v176_v44 }
  0xe1   :  { %v180_v46 = vpop.f32.mrf.mxu0 }
  0xe2   :  { %v283_v9 = vpop.f32.mrf.mxu1  ;;  %v282_v13 = vadd.f32 %v281_v61, %v180_v46 }
  0xe3   :  { %v182_v49 = vpop.f32.mrf.mxu0 }
  0xe4   :  { %v284_v19 = vadd.f32 %v283_v9, %v182_v49 }
  0xe7   :  { %v387_v51 = vpop.f32.mrf.mxu0 }
  0xe8   :  { %v410_v4 = vadd.f32 %v387_v51, %v264_v59 }
  0xe9   :  { %v389_v54 = vpop.f32.mrf.mxu0 }
  0xea   :  { %v411_v10 = vadd.f32 %v389_v54, %v266_v1  ;;  %v2952_v15 = vadd.f32 %v423_v63, %v410_v4 }
  0xeb   :  { %v393_v58 = vpop.f32.mrf.mxu0 }
  0xec   :  { %v412_v62 = vadd.f32 %v393_v58, %v270_v55  ;;  %v2958_v21 = vadd.f32 %v427_v6, %v411_v10 }
  0xed   :  { %v395_v0 = vpop.f32.mrf.mxu0 }
  0xee   :  { %v413_v5 = vadd.f32 %v395_v0, %v272_v60  ;;  %v2950_v11 = vadd.f32 %v423_v63, %v412_v62 }
  0xef   :  { %v399_v7 = vpop.f32.mrf.mxu0 }
  0xf0   :  { %v414_v12 = vadd.f32 %v399_v7, %v276_v2  ;;  %v2954_v16 = vadd.f32 %v427_v6, %v413_v5  ;;  %v472_v22 = vadd.f32 %v2950_v11, %v2952_v15 }
  0xf1   :  { %v401_v14 = vpop.f32.mrf.mxu0 }
  0xf2   :  { %v2956_v17 = vadd.f32 %v423_v63, %v414_v12  ;;  %v415_v18 = vadd.f32 %v401_v14, %v278_v8  ;;  %v481_v26 = vadd.f32 %v2954_v16, %v2958_v21 }
  0xf3   :  { %v405_v20 = vpop.f32.mrf.mxu0 }
  0xf4   :  { %v2962_v23 = vadd.f32 %v427_v6, %v415_v18  ;;  %v416_v24 = vadd.f32 %v405_v20, %v282_v13  ;;  %v473_v27 = vadd.f32 %v472_v22, %v2956_v17 }
  0xf5   :  { %v407_v25 = vpop.f32.mrf.mxu0 }
  0xf6   :  { %v2967_v28 = vadd.f32 %v423_v63, %v416_v24  ;;  %v417_v29 = vadd.f32 %v407_v25, %v284_v19  ;;  %v482_v30 = vadd.f32 %v481_v26, %v2962_v23 }
  0xf8   :  { %v474_v31 = vadd.f32 %v473_v27, %v2967_v28  ;;  %v2971_v32 = vadd.f32 %v427_v6, %v417_v29 }
  0xfa   :  { %v475_v33 = vrot.slane %v474_v31, 4  ;;  %v483_v34 = vadd.f32 %v482_v30, %v2971_v32 }
  0xfc   :  { %v476_v35 = vadd.f32 %v475_v33, %v474_v31  ;;  %v484_v36 = vrot.slane %v483_v34, 4 }
  0xfe   :  { %v477_v37 = vrot.slane %v476_v35, 2  ;;  %v485_v38 = vadd.f32 %v484_v36, %v483_v34 }
 0x100   :  { %v478_v39 = vadd.f32 %v477_v37, %v476_v35  ;;  %v486_v40 = vrot.slane %v485_v38, 2 }
 0x102   :  { %v487_v41 = vadd.f32 %v486_v40, %v485_v38  ;;  %v479_v42 = vrot.slane %v478_v39, 1  ;;  %v951_v40 = vld [vmem:[#allocation2 + $0x10] sm:$0xfe] }
 0x104   :  { %v488_v43 = vrot.slane %v487_v41, 1  ;;  %v480_v45 = vadd.f32 %v479_v42, %v478_v39  ;;  %v3038_v39 = vld [vmem:[#allocation2 + $0x28] sm:$0xff]  ;;  %v2301_v42 = vld [vmem:[%s4217_s6 + $0x470] sm:$0xff] }
 0x106   :  { %v489_v44 = vadd.f32 %v488_v43, %v487_v41  ;;  %v2302_v41 = vld [vmem:[%s4217_s6 + $0x478] sm:$0xff]  ;;  %v2300_v43 = vld [vmem:[%s4217_s6 + $0x468] sm:$0xff] }
 0x107   :  { %1212 = vmatprep.subr.mxu0 %v2302_v41  ;;  %v889_v41 = vld [vmem:[%s4217_s6 + $0x60] sm:$0xff] }
 0x108   :  { %554 = vmatprep.mubr.f32.mxu1 %v489_v44  ;;  %v2299_v44 = vld [vmem:[%s4217_s6 + $0x460] sm:$0xff] }
 0x109   :  { %555 = vmatmul.mubr.f32.vlgmr.msra.gmra.mxu1 %v480_v45  ;;  %v2298_v45 = vld [vmem:[%s4217_s6 + $0x458] sm:$0xff] }
 0x1c9   :  { %v2419_v46 = vpop.f32.mrf.mxu1 }
 0x1cb   :  { %v2420_v47 = vpop.f32.mrf.mxu1 }
 0x1cc   :  { %v2421_v48 = vadd.f32 %v2420_v47, %v2419_v46  ;;  %v986_v46 = vrot.slane %v951_v40, 1  ;;  %v987_v47 = vrot.slane %v3038_v39, 1  ;;  %v890_v40 = vld [vmem:[%s4217_s6 + $0x68] sm:$0xff] }
 0x1ce   :  { %v560_v49 = vmul.f32 0.001953125, %v2421_v48  ;;  %v2297_v48 = vld [vmem:[%s4217_s6 + $0x450] sm:$0xff] }
 0x1d0   :  { %568 = vrot.lane.b32.xlu1 %v560_v49, %s2543_s2  ;;  %562 = vrot.lane.b32.xlu0 %v560_v49, %s2544_s17 }
 0x1d4   :  { %571 = vrot.lane.b32.xlu1 %v560_v49, %s2545_s18  ;;  %565 = vrot.lane.b32.xlu0 %v560_v49, %s2546_s19 }
 0x1d8   :  { %577 = vrot.lane.b32.xlu1 %v560_v49, %s2547_s20  ;;  %574 = vrot.lane.b32.xlu0 %v560_v49, %s2548_s0 }
 0x1dc   :  { %580 = vrot.lane.b32.xlu0 %v560_v49, %s2549_s21 }
 0x242   :  { %v569_v51 = vpop.permute.xlu1 %568  ;;  %v563_v52 = vpop.permute.xlu0 %562 }
 0x243   :  { %v584_v54 = vsel %vm583_vm2, %v560_v49, %v563_v52  ;;  %v2262_v49 = vld [vmem:[%s4217_s6 + $0x338] sm:$0xff]  ;;  %v2261_v52 = vld [vmem:[%s4217_s6 + $0x330] sm:$0xff] }
 0x244   :  { %1099 = vmatprep.subr.mxu1 %v2262_v49 }
 0x245   :  { %1100 = vmatpush1.msra.mxu1 %v2261_v52  ;;  %v2241_v52 = vld [vmem:[%s4217_s6 + $0x290] sm:$0xff] }
 0x246   :  { %v572_v55 = vpop.permute.xlu1 %571  ;;  %v566_v56 = vpop.permute.xlu0 %565 }
 0x247   :  { %v586_v58 = vsel %vm585_vm1, %v584_v54, %v566_v56  ;;  %v2295_v54 = vld [vmem:[%s4217_s6 + $0x440] sm:$0xff] }
 0x248   :  { %v588_v59 = vsel %vm587_vm3, %v586_v58, %v569_v51  ;;  %v2296_v51 = vld [vmem:[%s4217_s6 + $0x448] sm:$0xff]  ;;  %v2259_v56 = vld [vmem:[%s4217_s6 + $0x320] sm:$0xff]  ;;  %v908_v58 = vld [vmem:[%s4217_s6 + $0xf8] sm:$0xff] }
 0x249   :  { %v590_v60 = vsel %vm589_vm4, %v588_v59, %v572_v55  ;;  %v2260_v55 = vld [vmem:[%s4217_s6 + $0x328] sm:$0xff]  ;;  %v988_v59 = vsel %vm979_vm8, %v986_v46, %v987_v47 }
 0x24a   :  { %v575_v61 = vpop.permute.xlu0 %574  ;;  %v578_v62 = vpop.permute.xlu1 %577  ;;  %1101 = vmatprep.subr.mxu1 %v2260_v55  ;;  %v2240_v55 = vld [vmem:[%s4217_s6 + $0x288] sm:$0xff] }
 0x24b   :  { %v592_v63 = vsel %vm591_vm5, %v590_v60, %v575_v61  ;;  %v2258_v60 = vld [vmem:[%s4217_s6 + $0x318] sm:$0xff]  ;;  %v907_v61 = vld [vmem:[%s4217_s6 + $0xf0] sm:$0xff]  ;;  %1102 = vmatpush1.msra.mxu1 %v2259_v56 }
 0x24c   :  { %v594_v0 = vsel %vm593_vm6, %v592_v63, %v578_v62  ;;  %v2257_v62 = vld [vmem:[%s4217_s6 + $0x310] sm:$0xff]  ;;  %v906_v63 = vld [vmem:[%s4217_s6 + $0xe8] sm:$0xff]  ;;  %1103 = vmatprep.subr.mxu1 %v2258_v60  ;;  %v2238_v60 = vld [vmem:[%s4217_s6 + $0x278] sm:$0xff] }
 0x24d   :  { %1104 = vmatpush1.msra.mxu1 %v2257_v62  ;;  %v883_v56 = vld [vmem:[%s4217_s6 + $0x30] sm:$0xff] }
 0x24e   :  { %v581_v1 = vpop.permute.xlu0 %580  ;;  %v2237_v62 = vld [vmem:[%s4217_s6 + $0x270] sm:$0xff] }
 0x24f   :  { %v596_v2 = vsel %vm595_vm7, %v594_v0, %v581_v1  ;;  %v2256_v0 = vld [vmem:[%s4217_s6 + $0x308] sm:$0xff]  ;;  %v905_v1 = vld [vmem:[%s4217_s6 + $0xe0] sm:$0xff] }
 0x250   :  { %v600_v4 = vrot.slane %v596_v2, %v2940_v53  ;;  %v2255_v2 = vld [vmem:[%s4217_s6 + $0x300] sm:$0xff]  ;;  %1105 = vmatprep.subr.mxu1 %v2256_v0  ;;  %v2236_v0 = vld [vmem:[%s4217_s6 + $0x268] sm:$0xff] }
 0x251   :  { %1106 = vmatpush1.msra.mxu1 %v2255_v2  ;;  %v2235_v2 = vld [vmem:[%s4217_s6 + $0x260] sm:$0xff] }
 0x252   :  { %v2998_v5 = vsub.f32 %v2958_v21, %v600_v4  ;;  %v3001_v6 = vsub.f32 %v2954_v16, %v600_v4  ;;  %v3004_v7 = vsub.f32 %v2962_v23, %v600_v4  ;;  %v3007_v8 = vsub.f32 %v2952_v15, %v600_v4 }
 0x253   :  { %v3010_v9 = vsub.f32 %v2950_v11, %v600_v4  ;;  %v3013_v10 = vsub.f32 %v2956_v17, %v600_v4  ;;  %v3016_v12 = vsub.f32 %v2971_v32, %v600_v4  ;;  %v3023_v16 = vsub.f32 %v2967_v28, %v600_v4  ;;  %v904_v4 = vld [vmem:[%s4217_s6 + $0xd8] sm:$0xff] }
 0x254   :  { %v610_v13 = vmul.f32 %v2998_v5, %v2998_v5  ;;  %v612_v14 = vmul.f32 %v3001_v6, %v3001_v6  ;;  %v609_v15 = vmul.f32 %v3007_v8, %v3007_v8  ;;  %v614_v17 = vmul.f32 %v3004_v7, %v3004_v7 }
 0x255   :  { %v611_v11 = vmul.f32 %v3010_v9, %v3010_v9  ;;  %v613_v19 = vmul.f32 %v3013_v10, %v3013_v10  ;;  %v616_v21 = vmul.f32 %v3016_v12, %v3016_v12  ;;  %v615_v23 = vmul.f32 %v3023_v16, %v3023_v16 }
 0x256   :  { %v626_v18 = vadd.f32 %v612_v14, %v610_v13  ;;  %v2254_v13 = vld [vmem:[%s4217_s6 + $0x2f8] sm:$0xff]  ;;  %v903_v14 = vld [vmem:[%s4217_s6 + $0xd0] sm:$0xff] }
 0x257   :  { %v617_v20 = vadd.f32 %v611_v11, %v609_v15  ;;  %v2253_v15 = vld [vmem:[%s4217_s6 + $0x2f0] sm:$0xff]  ;;  %v902_v11 = vld [vmem:[%s4217_s6 + $0xc8] sm:$0xff]  ;;  %1107 = vmatprep.subr.mxu1 %v2254_v13  ;;  %v2234_v13 = vld [vmem:[%s4217_s6 + $0x258] sm:$0xff] }
 0x258   :  { %v627_v22 = vadd.f32 %v626_v18, %v614_v17  ;;  %v2252_v17 = vld [vmem:[%s4217_s6 + $0x2e8] sm:$0xff]  ;;  %v901_v18 = vld [vmem:[%s4217_s6 + $0xc0] sm:$0xff]  ;;  %1108 = vmatpush1.msra.mxu1 %v2253_v15  ;;  %v2233_v15 = vld [vmem:[%s4217_s6 + $0x250] sm:$0xff] }
 0x259   :  { %v618_v24 = vadd.f32 %v617_v20, %v613_v19  ;;  %v2251_v19 = vld [vmem:[%s4217_s6 + $0x2e0] sm:$0xff]  ;;  %v900_v20 = vld [vmem:[%s4217_s6 + $0xb8] sm:$0xff]  ;;  %1109 = vmatprep.subr.mxu1 %v2252_v17  ;;  %v2232_v17 = vld [vmem:[%s4217_s6 + $0x248] sm:$0xff] }
 0x25a   :  { %v628_v25 = vadd.f32 %v627_v22, %v616_v21  ;;  %v2250_v21 = vld [vmem:[%s4217_s6 + $0x2d8] sm:$0xff]  ;;  %v899_v22 = vld [vmem:[%s4217_s6 + $0xb0] sm:$0xff]  ;;  %1110 = vmatpush1.msra.mxu1 %v2251_v19  ;;  %v2231_v19 = vld [vmem:[%s4217_s6 + $0x240] sm:$0xff] }
 0x25b   :  { %v619_v26 = vadd.f32 %v618_v24, %v615_v23  ;;  %v2249_v23 = vld [vmem:[%s4217_s6 + $0x2d0] sm:$0xff]  ;;  %v898_v24 = vld [vmem:[%s4217_s6 + $0xa8] sm:$0xff]  ;;  %1111 = vmatprep.subr.mxu1 %v2250_v21  ;;  %v2294_v21 = vld [vmem:[%s4217_s6 + $0x438] sm:$0xff] }
 0x25c   :  { %v629_v27 = vrot.slane %v628_v25, 4  ;;  %1112 = vmatpush1.msra.mxu1 %v2249_v23 }
 0x25d   :  { %v620_v28 = vrot.slane %v619_v26, 4 }
 0x25e   :  { %v630_v29 = vadd.f32 %v629_v27, %v628_v25  ;;  %v2248_v25 = vld [vmem:[%s4217_s6 + $0x2c8] sm:$0xff]  ;;  %v2247_v27 = vld [vmem:[%s4217_s6 + $0x2c0] sm:$0xff] }
 0x25f   :  { %v621_v30 = vadd.f32 %v620_v28, %v619_v26  ;;  %v897_v26 = vld [vmem:[%s4217_s6 + $0xa0] sm:$0xff]  ;;  %v896_v28 = vld [vmem:[%s4217_s6 + $0x98] sm:$0xff]  ;;  %1113 = vmatprep.subr.mxu1 %v2248_v25 }
 0x260   :  { %v631_v31 = vrot.slane %v630_v29, 2  ;;  %1114 = vmatpush1.msra.mxu1 %v2247_v27  ;;  %v936_v25 = vld [vmem:[%s4217_s6 + $0x1d8] sm:$0xff]  ;;  %v935_v27 = vld [vmem:[%s4217_s6 + $0x1d0] sm:$0xff] }
 0x261   :  { %v622_v32 = vrot.slane %v621_v30, 2 }
 0x262   :  { %v632_v33 = vadd.f32 %v631_v31, %v630_v29  ;;  %v2246_v29 = vld [vmem:[%s4217_s6 + $0x2b8] sm:$0xff]  ;;  %v2245_v31 = vld [vmem:[%s4217_s6 + $0x2b0] sm:$0xff] }
 0x263   :  { %v623_v34 = vadd.f32 %v622_v32, %v621_v30  ;;  %v895_v30 = vld [vmem:[%s4217_s6 + $0x90] sm:$0xff]  ;;  %v894_v32 = vld [vmem:[%s4217_s6 + $0x88] sm:$0xff]  ;;  %1115 = vmatprep.subr.mxu1 %v2246_v29 }
 0x264   :  { %v633_v35 = vrot.slane %v632_v33, 1  ;;  %1116 = vmatpush1.msra.mxu1 %v2245_v31  ;;  %v934_v29 = vld [vmem:[%s4217_s6 + $0x1c8] sm:$0xff]  ;;  %v933_v31 = vld [vmem:[%s4217_s6 + $0x1c0] sm:$0xff] }
 0x265   :  { %v624_v36 = vrot.slane %v623_v34, 1 }
 0x266   :  { %v634_v37 = vadd.f32 %v633_v35, %v632_v33  ;;  %v2244_v33 = vld [vmem:[%s4217_s6 + $0x2a8] sm:$0xff]  ;;  %v2243_v35 = vld [vmem:[%s4217_s6 + $0x2a0] sm:$0xff] }
 0x267   :  { %v625_v38 = vadd.f32 %v624_v36, %v623_v34  ;;  %v893_v34 = vld [vmem:[%s4217_s6 + $0x80] sm:$0xff]  ;;  %v892_v36 = vld [vmem:[%s4217_s6 + $0x78] sm:$0xff]  ;;  %1117 = vmatprep.subr.mxu1 %v2244_v33 }
 0x268   :  { %699 = vmatprep.mubr.f32.mxu0 %v634_v37  ;;  %v2242_v37 = vld [vmem:[%s4217_s6 + $0x298] sm:$0xff]  ;;  %1118 = vmatpush1.msra.mxu1 %v2243_v35  ;;  %v931_v35 = vld [vmem:[%s4217_s6 + $0x1b0] sm:$0xff] }
 0x269   :  { %700 = vmatmul.mubr.f32.vlgmr.msra.gmra.mxu0 %v625_v38  ;;  %v891_v38 = vld [vmem:[%s4217_s6 + $0x70] sm:$0xff]  ;;  %1119 = vmatprep.subr.mxu1 %v2242_v37  ;;  %v932_v33 = vld [vmem:[%s4217_s6 + $0x1b8] sm:$0xff]  ;;  %v2287_v37 = vld [vmem:[%s4217_s6 + $0x400] sm:$0xff] }
 0x26a   :  { %1252 = vmatprep.mubr.f32.mxu0 %v2542_v3  ;;  %1213 = vmatpush1.msra.mxu0 %v2301_v42  ;;  %v888_v42 = vld [vmem:[%s4217_s6 + $0x58] sm:$0xff] }
 0x26b   :  { %1214 = vmatprep.subr.mxu0 %v2300_v43  ;;  %v887_v43 = vld [vmem:[%s4217_s6 + $0x50] sm:$0xff]  ;;  %1120 = vmatpush1.msra.mxu1 %v2241_v52 }
 0x26c   :  { %1215 = vmatpush1.msra.mxu0 %v2299_v44  ;;  %v886_v44 = vld [vmem:[%s4217_s6 + $0x48] sm:$0xff]  ;;  %1121 = vmatprep.subr.mxu1 %v2240_v55 }
 0x26d   :  { %1216 = vmatprep.subr.mxu0 %v2298_v45  ;;  %v885_v45 = vld [vmem:[%s4217_s6 + $0x40] sm:$0xff]  ;;  %v2280_v55 = vld [vmem:[%s4217_s6 + $0x3c8] sm:$0xff] }
 0x26e   :  { %1217 = vmatpush1.msra.mxu0 %v2297_v48 }
 0x26f   :  { %1218 = vmatprep.subr.mxu0 %v2296_v51 }
 0x270   :  { %1219 = vmatpush1.msra.mxu0 %v2295_v54  ;;  %v884_v54 = vld [vmem:[%s4217_s6 + $0x38] sm:$0xff] }
 0x271   :  { %1287 = vmatprep.subr.mxu0 %v908_v58  ;;  %2303 = vmatmul.mubr.msk.f32.vlgmr.msra.gmra.mxu0 %vm585_vm1, %v988_v59  ;;  %v2239_v58 = vld [vmem:[%s4217_s6 + $0x280] sm:$0xff]  ;;  %v882_v59 = vld [vmem:[%s4217_s6 + $0x28] sm:$0xff] }
 0x272   :  { %1288 = vmatpush1.msra.mxu0 %v907_v61  ;;  %1258 = vmatprep.mubr.f32.mxu0 %v2542_v3  ;;  %v881_v61 = vld [vmem:[%s4217_s6 + $0x20] sm:$0xff] }
 0x273   :  { %1289 = vmatprep.subr.mxu0 %v906_v63  ;;  %1122 = vmatpush1.msra.mxu1 %v2239_v58  ;;  %v880_v63 = vld [vmem:[%s4217_s6 + $0x18] sm:$0xff]  ;;  %v923_v58 = vld [vmem:[%s4217_s6 + $0x170] sm:$0xff] }
 0x274   :  { %1290 = vmatpush1.msra.mxu0 %v905_v1  ;;  %1123 = vmatprep.subr.mxu1 %v2238_v60  ;;  %v879_v1 = vld [vmem:[%s4217_s6 + $0x10] sm:$0xff]  ;;  %v922_v60 = vld [vmem:[%s4217_s6 + $0x168] sm:$0xff] }
 0x275   :  { %1291 = vmatprep.subr.mxu0 %v904_v4  ;;  %1124 = vmatpush1.msra.mxu1 %v2237_v62  ;;  %v878_v4 = vld [vmem:[%s4217_s6 + $0x8] sm:$0xff]  ;;  %v921_v62 = vld [vmem:[%s4217_s6 + $0x160] sm:$0xff] }
 0x276   :  { %1292 = vmatpush1.msra.mxu0 %v903_v14  ;;  %1125 = vmatprep.subr.mxu1 %v2236_v0  ;;  %v877_v14 = vld [vmem:[%s4217_s6] sm:$0xff]  ;;  %v3396_v0 = vld [vmem:[#allocation2 + $0x70] sm:$0xff] }
 0x277   :  { %1293 = vmatprep.subr.mxu0 %v902_v11  ;;  %1126 = vmatpush1.msra.mxu1 %v2235_v2  ;;  %v940_v11 = vld [vmem:[%s4217_s6 + $0x1f8] sm:$0xff] }
 0x278   :  { %1294 = vmatpush1.msra.mxu0 %v901_v18  ;;  %1127 = vmatprep.subr.mxu1 %v2234_v13  ;;  %v939_v18 = vld [vmem:[%s4217_s6 + $0x1f0] sm:$0xff]  ;;  %v920_v2 = vld [vmem:[%s4217_s6 + $0x158] sm:$0xff]  ;;  %v2276_v13 = vld [vmem:[%s4217_s6 + $0x3a8] sm:$0xff] }
 0x279   :  { %1295 = vmatprep.subr.mxu0 %v900_v20  ;;  %1128 = vmatpush1.msra.mxu1 %v2233_v15  ;;  %v938_v20 = vld [vmem:[%s4217_s6 + $0x1e8] sm:$0xff] }
 0x27a   :  { %1296 = vmatpush1.msra.mxu0 %v899_v22  ;;  %1129 = vmatprep.subr.mxu1 %v2232_v17  ;;  %v937_v22 = vld [vmem:[%s4217_s6 + $0x1e0] sm:$0xff]  ;;  %v918_v17 = vld [vmem:[%s4217_s6 + $0x148] sm:$0xff] }
 0x27b   :  { %1297 = vmatprep.subr.mxu0 %v898_v24  ;;  %1130 = vmatpush1.msra.mxu1 %v2231_v19  ;;  %v2293_v24 = vld [vmem:[%s4217_s6 + $0x430] sm:$0xff]  ;;  %v917_v19 = vld [vmem:[%s4217_s6 + $0x140] sm:$0xff] }
 0x27c   :  { %1298 = vmatpush1.msra.mxu0 %v897_v26  ;;  %1131 = vmatprep.subr.mxu1 %v2294_v21  ;;  %v2292_v26 = vld [vmem:[%s4217_s6 + $0x428] sm:$0xff] }
 0x27d   :  { %1299 = vmatprep.subr.mxu0 %v896_v28  ;;  %1132 = vmatpush2.msra.mxu1 %v2293_v24  ;;  %v2291_v28 = vld [vmem:[%s4217_s6 + $0x420] sm:$0xff] }
 0x27e   :  { %1300 = vmatpush1.msra.mxu0 %v895_v30  ;;  %1133 = vmatprep.subr.mxu1 %v2292_v26  ;;  %v2290_v30 = vld [vmem:[%s4217_s6 + $0x418] sm:$0xff]  ;;  %v915_v26 = vld [vmem:[%s4217_s6 + $0x130] sm:$0xff] }
 0x27f   :  { %1301 = vmatprep.subr.mxu0 %v894_v32  ;;  %1134 = vmatpush2.msra.mxu1 %v2291_v28  ;;  %v2289_v32 = vld [vmem:[%s4217_s6 + $0x410] sm:$0xff]  ;;  %v2271_v28 = vld [vmem:[%s4217_s6 + $0x380] sm:$0xff] }
 0x280   :  { %1302 = vmatpush1.msra.mxu0 %v893_v34  ;;  %v2288_v34 = vld [vmem:[%s4217_s6 + $0x408] sm:$0xff]  ;;  %1135 = vmatprep.subr.mxu1 %v2290_v30  ;;  %v2270_v30 = vld [vmem:[%s4217_s6 + $0x378] sm:$0xff] }
 0x281   :  { %1303 = vmatprep.subr.mxu0 %v892_v36  ;;  %v3323_v36 = vld [vmem:[#allocation2] sm:$0xff]  ;;  %1136 = vmatpush2.msra.mxu1 %v2289_v32  ;;  %v2269_v32 = vld [vmem:[%s4217_s6 + $0x370] sm:$0xff] }
 0x282   :  { %1304 = vmatpush1.msra.mxu0 %v891_v38  ;;  %810 = vst.msk [vmem:[#allocation2 + $0x40] sm:$0x3] %vm809_vm9, %v3323_v36  ;;  %819 = vst.msk [vmem:[#allocation2 + $0x88] sm:$0x3] %vm809_vm9, %v3323_v36  ;;  %v930_v38 = vld [vmem:[%s4217_s6 + $0x1a8] sm:$0xff]  ;;  %1137 = vmatprep.subr.mxu1 %v2288_v34  ;;  %v912_v34 = vld [vmem:[%s4217_s6 + $0x118] sm:$0xff] }
 0x283   :  { %1305 = vmatprep.subr.mxu0 %v890_v40  ;;  %v2286_v40 = vld [vmem:[%s4217_s6 + $0x3f8] sm:$0xff]  ;;  %1138 = vmatpush2.msra.mxu1 %v2287_v37  ;;  %v911_v37 = vld [vmem:[%s4217_s6 + $0x110] sm:$0xff] }
 0x284   :  { %1306 = vmatpush1.msra.mxu0 %v889_v41  ;;  %v929_v41 = vld [vmem:[%s4217_s6 + $0x1a0] sm:$0xff]  ;;  %1139 = vmatprep.subr.mxu1 %v2286_v40  ;;  %v910_v40 = vld [vmem:[%s4217_s6 + $0x108] sm:$0xff] }
 0x285   :  { %1307 = vmatprep.subr.mxu0 %v888_v42  ;;  %v2285_v42 = vld [vmem:[%s4217_s6 + $0x3f0] sm:$0xff] }
 0x286   :  { %1308 = vmatpush1.msra.mxu0 %v887_v43  ;;  %v928_v43 = vld [vmem:[%s4217_s6 + $0x198] sm:$0xff]  ;;  %1140 = vmatpush2.msra.mxu1 %v2285_v42  ;;  %v909_v42 = vld [vmem:[%s4217_s6 + $0x100] sm:$0xff] }
 0x287   :  { %1309 = vmatprep.subr.mxu0 %v886_v44  ;;  %v2284_v44 = vld [vmem:[%s4217_s6 + $0x3e8] sm:$0xff] }
 0x288   :  { %1310 = vmatpush1.msra.mxu0 %v885_v45  ;;  %v927_v45 = vld [vmem:[%s4217_s6 + $0x190] sm:$0xff]  ;;  %1141 = vmatprep.subr.mxu1 %v2284_v44  ;;  %v2264_v44 = vld [vmem:[%s4217_s6 + $0x348] sm:$0xff] }
 0x289   :  { %1311 = vmatprep.subr.mxu0 %v884_v54  ;;  %v954_v52 = vld [vmem:[#allocation2 + $0x40] sm:$0x1]  ;;  %v924_v54 = vld [vmem:[%s4217_s6 + $0x178] sm:$0xff]  ;;  %v960_v24 = vld [vmem:[#allocation2 + $0x88] sm:$0x1] }
 0x28a   :  { %1312 = vmatpush1.msra.mxu0 %v883_v56  ;;  %v993_v56 = vrot.slane %v954_v52, 1 }
 0x28b   :  { %1313 = vmatprep.subr.mxu0 %v882_v59  ;;  %v2279_v59 = vld [vmem:[%s4217_s6 + $0x3c0] sm:$0xff] }
 0x28c   :  { %1314 = vmatpush1.msra.mxu0 %v881_v61  ;;  %v2278_v61 = vld [vmem:[%s4217_s6 + $0x3b8] sm:$0xff] }
 0x28d   :  { %1315 = vmatprep.subr.mxu0 %v880_v63  ;;  %v2277_v63 = vld [vmem:[%s4217_s6 + $0x3b0] sm:$0xff] }
 0x28e   :  { %1316 = vmatpush1.msra.mxu0 %v879_v1  ;;  %v994_v1 = vsel %vm979_vm8, %v987_v47, %v993_v56  ;;  %v2275_v47 = vld [vmem:[%s4217_s6 + $0x3a0] sm:$0xff]  ;;  %v2550_v56 = vmov 1966171168  }
 0x28f   :  { %1317 = vmatprep.subr.mxu0 %v878_v4  ;;  %v957_v4 = vld [vmem:[#allocation2 + $0x58] sm:$0xfe]  ;;  %2304 = vmatmul.mubr.msk.f32.gmra.mxu0 %vm585_vm1, %v994_v1 }
 0x290   :  { %1318 = vmatpush1.msra.mxu0 %v877_v14  ;;  %v919_v14 = vld [vmem:[%s4217_s6 + $0x150] sm:$0xff]  ;;  %v1001_v15 = vrot.slane %v957_v4, 1  ;;  %1264 = vmatprep.mubr.f32.mxu0 %v3323_v36 }
 0x291   :  { %1319 = vmatprep.subr.mxu0 %v940_v11  ;;  %v1002_v11 = vrot.slane %v3396_v0, 1 }
 0x292   :  { %1320 = vmatpush2.msra.mxu0 %v939_v18  ;;  %v2274_v18 = vld [vmem:[%s4217_s6 + $0x398] sm:$0xff] }
 0x293   :  { %1321 = vmatprep.subr.mxu0 %v938_v20  ;;  %v2273_v20 = vld [vmem:[%s4217_s6 + $0x390] sm:$0xff]  ;;  %v1003_v21 = vsel %vm979_vm8, %v1001_v15, %v1002_v11 }
 0x294   :  { %1322 = vmatpush2.msra.mxu0 %v937_v22  ;;  %v916_v22 = vld [vmem:[%s4217_s6 + $0x138] sm:$0xff] }
 0x295   :  { %1323 = vmatprep.subr.mxu0 %v936_v25  ;;  %v2272_v25 = vld [vmem:[%s4217_s6 + $0x388] sm:$0xff]  ;;  %2305 = vmatmul.mubr.msk.f32.gmra.mxu0 %vm585_vm1, %v1003_v21 }
 0x296   :  { %1324 = vmatpush2.msra.mxu0 %v935_v27  ;;  %v1008_v27 = vrot.slane %v960_v24, 1  ;;  %1270 = vmatprep.mubr.f32.mxu0 %v3323_v36 }
 0x297   :  { %1325 = vmatprep.subr.mxu0 %v934_v29  ;;  %v914_v29 = vld [vmem:[%s4217_s6 + $0x128] sm:$0xff] }
 0x298   :  { %1326 = vmatpush2.msra.mxu0 %v933_v31  ;;  %v913_v31 = vld [vmem:[%s4217_s6 + $0x120] sm:$0xff] }
 0x299   :  { %1327 = vmatprep.subr.mxu0 %v932_v33  ;;  %v1009_v33 = vsel %vm979_vm8, %v1002_v11, %v1008_v27  ;;  %v470_v11 = vld [vmem:[%s4218_s3] sm:$0x3] }
 0x29a   :  { %1328 = vmatpush2.msra.mxu0 %v931_v35  ;;  %v2268_v35 = vld [vmem:[%s4217_s6 + $0x368] sm:$0xff] }
 0x29b   :  { %1329 = vmatprep.subr.mxu0 %v930_v38  ;;  %v2267_v38 = vld [vmem:[%s4217_s6 + $0x360] sm:$0xff]  ;;  %2306 = vmatmul.mubr.msk.f32.gmra.mxu0 %vm585_vm1, %v1009_v33 }
 0x29c   :  { %1330 = vmatpush2.msra.mxu0 %v929_v41  ;;  %v2266_v41 = vld [vmem:[%s4217_s6 + $0x358] sm:$0xff] }
 0x29d   :  { %1331 = vmatprep.subr.mxu0 %v928_v43  ;;  %v2265_v43 = vld [vmem:[%s4217_s6 + $0x350] sm:$0xff] }
 0x29e   :  { %1332 = vmatpush2.msra.mxu0 %v927_v45  ;;  %v2263_v45 = vld [vmem:[%s4217_s6 + $0x340] sm:$0xff] }
 0x329   :  { %v2454_v46 = vpop.f32.mrf.mxu0 }
 0x32b   :  { %v2455_v3 = vpop.f32.mrf.mxu0 }
 0x32c   :  { %v2456_v48 = vadd.f32 %v2455_v3, %v2454_v46  ;;  %v2283_v46 = vld [vmem:[%s4217_s6 + $0x3e0] sm:$0xff]  ;;  %v926_v3 = vld [vmem:[%s4217_s6 + $0x188] sm:$0xff] }
 0x32d   :  { %1142 = vmatpush2.msra.mxu1 %v2283_v46  ;;  %1333 = vmatprep.subr.mxu0 %v926_v3  ;;  %v948_v46 = vld [vmem:[%s4217_s6 + $0x238] sm:$0xff] }
 0x32e   :  { %v705_v49 = vmul.f32 0.001953125, %v2456_v48  ;;  %v2282_v48 = vld [vmem:[%s4217_s6 + $0x3d8] sm:$0xff] }
 0x32f   :  { %1143 = vmatprep.subr.mxu1 %v2282_v48  ;;  %v2382_v3 = vld [vmem:[%s4217_s6 + $0x6b8] sm:$0xff] }
 0x330   :  { %v706_v51 = vadd.f32 1e-05, %v705_v49  ;;  %v925_v49 = vld [vmem:[%s4217_s6 + $0x180] sm:$0xff] }
 0x331   :  { %1334 = vmatpush2.msra.mxu0 %v925_v49 }
 0x332   :  { %2536 = vrsqrt.f32 %v706_v51  ;;  %v2281_v51 = vld [vmem:[%s4217_s6 + $0x3d0] sm:$0xff]  ;;  %1335 = vmatprep.subr.mxu0 %v924_v54 }
 0x333   :  { %1144 = vmatpush2.msra.mxu1 %v2281_v51  ;;  %1336 = vmatpush2.msra.mxu0 %v923_v58  ;;  %v740_v58 = vunpack.c.l.s4 %v2550_v56  ;;  %v2380_v56 = vld [vmem:[%s4217_s6 + $0x6a8] sm:$0xff] }
 0x334   :  { %1145 = vmatprep.subr.mxu1 %v2280_v55  ;;  %1337 = vmatprep.subr.mxu0 %v922_v60 }
 0x335   :  { %1146 = vmatpush2.msra.mxu1 %v2279_v59  ;;  %1338 = vmatpush2.msra.mxu0 %v921_v62  ;;  %v741_v62 = vunpack.c.0.s8 %v740_v58 }
 0x336   :  { %1147 = vmatprep.subr.mxu1 %v2278_v61  ;;  %1339 = vmatprep.subr.mxu0 %v920_v2 }
 0x337   :  { %1148 = vmatpush2.msra.mxu1 %v2277_v63  ;;  %1340 = vmatpush2.msra.mxu0 %v919_v14  ;;  %v3501_v4 = vsub.s32 %v741_v62, %v2937_v50 }
 0x338   :  { %1149 = vmatprep.subr.mxu1 %v2276_v13  ;;  %1341 = vmatprep.subr.mxu0 %v918_v17  ;;  %v471_v17 = vld [vmem:[%s4219_s4] sm:$0x3] }
 0x339   :  { %1150 = vmatpush2.msra.mxu1 %v2275_v47  ;;  %1342 = vmatpush2.msra.mxu0 %v917_v19  ;;  %4249 = vst [vmem:[#allocation3_spill] sm:$0xff] %v3501_v4  ;;  %v778_v50 = vrot.slane %v471_v17, %v2940_v53  ;;  %v782_v19 = vrot.slane %v471_v17, %v2946_v57  ;;  %v946_v17 = vld [vmem:[%s4217_s6 + $0x228] sm:$0xff] }
 0x33a   :  { %1151 = vmatprep.subr.mxu1 %v2274_v18  ;;  %1343 = vmatprep.subr.mxu0 %v916_v22 }
 0x33b   :  { %1152 = vmatpush2.msra.mxu1 %v2273_v20  ;;  %1344 = vmatpush2.msra.mxu0 %v915_v26 }
 0x33c   :  { %1153 = vmatprep.subr.mxu1 %v2272_v25  ;;  %1345 = vmatprep.subr.mxu0 %v914_v29 }
 0x33d   :  { %1154 = vmatpush2.msra.mxu1 %v2271_v28  ;;  %1346 = vmatpush2.msra.mxu0 %v913_v31 }
 0x33e   :  { %1155 = vmatprep.subr.mxu1 %v2270_v30  ;;  %1347 = vmatprep.subr.mxu0 %v912_v34 }
 0x33f   :  { %v3277_v23 = vpop.eup %2536  ;;  %1156 = vmatpush2.msra.mxu1 %v2269_v32  ;;  %1348 = vmatpush2.msra.mxu0 %v911_v37 }
 0x340   :  { %712 = vrot.lane.b32.xlu0 %v3277_v23, %s2546_s19  ;;  %709 = vrot.lane.b32.xlu1 %v3277_v23, %s2544_s17 }
 0x341   :  { %1157 = vmatprep.subr.mxu1 %v2268_v35  ;;  %1349 = vmatprep.subr.mxu0 %v910_v40 }
 0x342   :  { %1158 = vmatpush2.msra.mxu1 %v2267_v38  ;;  %1350 = vmatpush2.msra.mxu0 %v909_v42 }
 0x343   :  { %1159 = vmatprep.subr.mxu1 %v2266_v41  ;;  %1722 = vmatprep.subr.mxu0 %v2382_v3 }
 0x344   :  { %718 = vrot.lane.b32.xlu0 %v3277_v23, %s2545_s18  ;;  %715 = vrot.lane.b32.xlu1 %v3277_v23, %s2543_s2 }
 0x345   :  { %1160 = vmatpush2.msra.mxu1 %v2265_v43 }
 0x346   :  { %1161 = vmatprep.subr.mxu1 %v2264_v44 }
 0x347   :  { %1162 = vmatpush2.msra.mxu1 %v2263_v45 }
 0x348   :  { %724 = vrot.lane.b32.xlu0 %v3277_v23, %s2547_s20  ;;  %721 = vrot.lane.b32.xlu1 %v3277_v23, %s2548_s0 }
 0x349   :  { %1400 = vmatprep.subr.mxu1 %v948_v46 }
 0x34c   :  { %727 = vrot.lane.b32.xlu1 %v3277_v23, %s2549_s21 }
 0x3b2   :  { %v713_v48 = vpop.permute.xlu0 %712  ;;  %v710_v49 = vpop.permute.xlu1 %709 }
 0x3b3   :  { %v730_v51 = vsel %vm583_vm2, %v3277_v23, %v710_v49 }
 0x3b4   :  { %v731_v54 = vsel %vm585_vm1, %v730_v51, %v713_v48 }
 0x3b6   :  { %v719_v52 = vpop.permute.xlu0 %718  ;;  %v716_v55 = vpop.permute.xlu1 %715 }
 0x3b7   :  { %v732_v59 = vsel %vm587_vm3, %v731_v54, %v716_v55  ;;  %v2381_v55 = vld [vmem:[%s4217_s6 + $0x6b0] sm:$0xff] }
 0x3b8   :  { %v733_v60 = vsel %vm589_vm4, %v732_v59, %v719_v52 }
 0x3ba   :  { %v722_v61 = vpop.permute.xlu1 %721  ;;  %v725_v63 = vpop.permute.xlu0 %724 }
 0x3bb   :  { %v734_v1 = vsel %vm591_vm5, %v733_v60, %v722_v61 }
 0x3bc   :  { %v735_v2 = vsel %vm593_vm6, %v734_v1, %v725_v63 }
 0x3be   :  { %v728_v23 = vpop.permute.xlu1 %727 }
 0x3bf   :  { %v736_v13 = vsel %vm595_vm7, %v735_v2, %v728_v23 }
 0x3c0   :  { %v738_v14 = vcombine.low %v736_v13, %v736_v13 }
 0x3c2   :  { %v745_v15 = vrot.slane %v738_v14, %v3501_v4 }
 0x3c4   :  { %v752_v47 = vrot.slane %v745_v15, %v3501_v4  ;;  %v2379_v15 = vld [vmem:[%s4217_s6 + $0x6a0] sm:$0xff] }
 0x3c6   :  { %v754_v18 = vmul.f32 %v752_v47, %v470_v11  ;;  %v947_v47 = vld [vmem:[%s4217_s6 + $0x230] sm:$0xff] }
 0x3c8   :  { %v759_v20 = vrot.slane %v754_v18, %v2940_v53  ;;  %v763_v21 = vrot.slane %v754_v18, %v2946_v57 }
 0x3ca   :  { %v766_v22 = vmul.f32 %v759_v20, %v3007_v8  ;;  %v767_v24 = vmul.f32 %v763_v21, %v2998_v5  ;;  %v768_v25 = vmul.f32 %v759_v20, %v3010_v9  ;;  %v769_v26 = vmul.f32 %v763_v21, %v3001_v6 }
 0x3cb   :  { %v770_v27 = vmul.f32 %v759_v20, %v3013_v10  ;;  %v771_v28 = vmul.f32 %v763_v21, %v3004_v7  ;;  %v772_v29 = vmul.f32 %v759_v20, %v3023_v16  ;;  %v773_v30 = vmul.f32 %v763_v21, %v3016_v12 }
 0x3cc   :  { %v785_v31 = vadd.f32 %v778_v50, %v766_v22  ;;  %v786_v32 = vadd.f32 %v782_v19, %v767_v24  ;;  %v787_v33 = vadd.f32 %v778_v50, %v768_v25  ;;  %v788_v34 = vadd.f32 %v782_v19, %v769_v26  ;;  %v2378_v22 = vld [vmem:[%s4217_s6 + $0x698] sm:$0xff]  ;;  %v2377_v24 = vld [vmem:[%s4217_s6 + $0x690] sm:$0xff]  ;;  %v945_v26 = vld [vmem:[%s4217_s6 + $0x220] sm:$0xff] }
 0x3cd   :  { %v789_v35 = vadd.f32 %v778_v50, %v770_v27  ;;  %v790_v8 = vadd.f32 %v782_v19, %v771_v28  ;;  %v791_v37 = vadd.f32 %v778_v50, %v772_v29  ;;  %v792_v5 = vadd.f32 %v782_v19, %v773_v30 }
 0x3ce   :  { %v793_v38 = vmax.f32 %v785_v31, 0.0  ;;  %v794_v9 = vmax.f32 %v786_v32, 0.0  ;;  %v795_v40 = vmax.f32 %v787_v33, 0.0  ;;  %v796_v6 = vmax.f32 %v788_v34, 0.0  ;;  %v1467_v34 = vld [vmem:[#allocation2 + $0x10] sm:$0xfc] }
 0x3cf   :  { %v797_v41 = vmax.f32 %v789_v35, 0.0  ;;  %v798_v10 = vmax.f32 %v790_v8, 0.0  ;;  %v799_v42 = vmax.f32 %v791_v37, 0.0  ;;  %v800_v7 = vmax.f32 %v792_v5, 0.0  ;;  %v944_v37 = vld [vmem:[%s4217_s6 + $0x218] sm:$0xff] }
 0x3d0   :  { %v829_v43 = vrot.slane %v793_v38, 7  ;;  %v830_v16 = vrot.slane %v794_v9, 7  ;;  %v831_v44 = vrot.slane %v795_v40, 7  ;;  %v833_v12 = vrot.slane %v796_v6, 7  ;;  %v2376_v38 = vld [vmem:[%s4217_s6 + $0x688] sm:$0xff] }
 0x3d1   :  { %v835_v45 = vrot.slane %v797_v41, 7  ;;  %v836_v46 = vrot.slane %v798_v10, 7  ;;  %v837_v3 = vrot.slane %v799_v42, 7  ;;  %v839_v48 = vrot.slane %v800_v7, 7 }
 0x3d2   :  { %v3525_v49 = vsel %vm828_vm10, %v829_v43, %v831_v44  ;;  %v3528_v51 = vsel %vm828_vm10, %v830_v16, %v833_v12  ;;  %853 = vst [vmem:[#allocation2] sm:$0xfe] %v829_v43  ;;  %854 = vst [vmem:[#allocation2 + $0x8] sm:$0xfe] %v830_v16 }
 0x3d3   :  { %857 = vst [vmem:[#allocation2 + $0x30] sm:$0x1] %v831_v44  ;;  %858 = vst [vmem:[#allocation2 + $0x38] sm:$0x1] %v833_v12  ;;  %v3531_v52 = vsel %vm828_vm10, %v835_v45, %v837_v3  ;;  %v3534_v54 = vsel %vm828_vm10, %v836_v46, %v839_v48  ;;  %v984_v61 = vrot.slane %v3528_v51, 1  ;;  %v981_v23 = vrot.slane %v3525_v49, 1 }
 0x3d4   :  { %859 = vst [vmem:[#allocation2 + $0x48] sm:$0xfe] %v835_v45  ;;  %860 = vst [vmem:[#allocation2 + $0x50] sm:$0xfe] %v836_v46  ;;  %v999_v20 = vrot.slane %v3534_v54, 1  ;;  %v1491_v28 = vrot.slane %v3525_v49, 2 }
 0x3d5   :  { %863 = vst [vmem:[#allocation2 + $0x78] sm:$0x1] %v837_v3  ;;  %864 = vst [vmem:[#allocation2 + $0x80] sm:$0x1] %v839_v48  ;;  %v1509_v29 = vrot.slane %v3534_v54, 2  ;;  %v1506_v30 = vrot.slane %v3531_v52, 2 }
 0x3d6   :  { %v996_v12 = vrot.slane %v3531_v52, 1 }
 0x3d9   :  { %v866_v58 = vld [vmem:[#allocation2 + $0x8] sm:$0xff]  ;;  %v865_v59 = vld [vmem:[#allocation2] sm:$0xff] }
 0x3da   :  { %v950_v60 = vld [vmem:[#allocation2 + $0x8] sm:$0xfe]  ;;  %1351 = vmatprep.mubr.f32.mxu0 %v866_v58  ;;  %v949_v63 = vld [vmem:[#allocation2] sm:$0xfe]  ;;  %v953_v1 = vld [vmem:[#allocation2 + $0x38] sm:$0x1] }
 0x3db   :  { %v983_v62 = vrot.slane %v950_v60, 1  ;;  %1352 = vmatmul.mubr.f32.vlgmr.msra.gmra.mxu0 %v865_v59  ;;  %v980_v2 = vrot.slane %v949_v63, 1  ;;  %v991_v13 = vrot.slane %v953_v1, 1  ;;  %v952_v14 = vld [vmem:[#allocation2 + $0x30] sm:$0x1]  ;;  %v871_v44 = vld [vmem:[#allocation2 + $0x48] sm:$0xff] }
 0x3dc   :  { %1357 = vmatprep.mubr.f32.mxu0 %v3528_v51  ;;  %v956_v18 = vld [vmem:[#allocation2 + $0x50] sm:$0xfe]  ;;  %1723 = vmatpush1.msra.mxu0 %v2381_v55  ;;  %v989_v19 = vrot.slane %v952_v14, 1  ;;  %v955_v21 = vld [vmem:[#allocation2 + $0x48] sm:$0xfe] }
 0x3dd   :  { %v985_v11 = vsel %vm979_vm8, %v983_v62, %v984_v61  ;;  %v982_v50 = vsel %vm979_vm8, %v980_v2, %v981_v23  ;;  %1724 = vmatprep.subr.mxu0 %v2380_v56  ;;  %v872_v25 = vld [vmem:[#allocation2 + $0x50] sm:$0xff]  ;;  %v1465_v27 = vld [vmem:[#allocation2] sm:$0xfc]  ;;  %v992_v31 = vsel %vm979_vm8, %v984_v61, %v991_v13  ;;  %v998_v32 = vrot.slane %v956_v18, 1  ;;  %v959_v33 = vld [vmem:[#allocation2 + $0x80] sm:$0x1] }
 0x3de   :  { %1163 = vmatprep.mubr.f32.mxu1 %v985_v11  ;;  %1725 = vmatpush1.msra.mxu0 %v2379_v15  ;;  %v1490_v35 = vrot.slane %v1465_v27, 2  ;;  %v1468_v8 = vld [vmem:[#allocation2 + $0x30] sm:$0x3]  ;;  %v995_v5 = vrot.slane %v955_v21, 1  ;;  %v1472_v40 = vld [vmem:[#allocation2 + $0x50] sm:$0xfc]  ;;  %v990_v41 = vsel %vm979_vm8, %v981_v23, %v989_v19 }
 0x3df   :  { %1164 = vmatmul.mubr.f32.vlgmr.msra.gmra.mxu1 %v982_v50  ;;  %1358 = vmatmul.mubr.f32.gmra.mxu0 %v3525_v49  ;;  %v1499_v9 = vrot.slane %v1468_v8, 2  ;;  %v1471_v6 = vld [vmem:[#allocation2 + $0x48] sm:$0xfc]  ;;  %v1508_v42 = vrot.slane %v1472_v40, 2  ;;  %v1475_v43 = vld [vmem:[#allocation2 + $0x80] sm:$0x3]  ;;  %v1000_v49 = vsel %vm979_vm8, %v998_v32, %v999_v20 }
 0x3e0   :  { %1401 = vmatpush1.msra.mxu1 %v947_v47  ;;  %1169 = vmatprep.mubr.f32.mxu1 %v992_v31  ;;  %v3579_v10 = vsel %vm1489_vm11, %v1490_v35, %v1491_v28  ;;  %v1505_v7 = vrot.slane %v1471_v6, 2  ;;  %v1474_v16 = vld [vmem:[#allocation2 + $0x78] sm:$0x3]  ;;  %v1516_v3 = vrot.slane %v1475_v43, 2  ;;  %v1006_v55 = vrot.slane %v959_v33, 1  ;;  %v2375_v56 = vld [vmem:[%s4217_s6 + $0x680] sm:$0xff] }
 0x3e1   :  { %1363 = vmatprep.mubr.f32.mxu0 %v872_v25  ;;  %1402 = vmatprep.subr.mxu1 %v946_v17  ;;  %v958_v45 = vld [vmem:[#allocation2 + $0x78] sm:$0x1]  ;;  %v3583_v46 = vsel %vm1489_vm11, %v1491_v28, %v1499_v9  ;;  %v1514_v48 = vrot.slane %v1474_v16, 2  ;;  %v3592_v58 = vsel %vm1489_vm11, %v1508_v42, %v1509_v29  ;;  %v943_v60 = vld [vmem:[%s4217_s6 + $0x210] sm:$0xff]  ;;  %v1496_v61 = vrot.slane %v1467_v34, 2  ;;  %v942_v23 = vld [vmem:[%s4217_s6 + $0x208] sm:$0xff] }
 0x3e2   :  { %1726 = vmatprep.subr.mxu0 %v2378_v22  ;;  %1403 = vmatpush1.msra.mxu1 %v945_v26  ;;  %v3595_v59 = vsel %vm1489_vm11, %v1505_v7, %v1506_v30  ;;  %v1497_v62 = vrot.slane %v3038_v39, 2  ;;  %v3603_v63 = vsel %vm1489_vm11, %v1509_v29, %v1516_v3  ;;  %v997_v2 = vsel %vm979_vm8, %v995_v5, %v996_v12  ;;  %v941_v39 = vld [vmem:[%s4217_s6 + $0x200] sm:$0xff]  ;;  %v2342_v11 = vld [vmem:[%s4217_s6 + $0x578] sm:$0xff]  ;;  %v2341_v50 = vld [vmem:[%s4217_s6 + $0x570] sm:$0xff] }
 0x3e3   :  { %1170 = vmatmul.mubr.f32.gmra.mxu1 %v990_v41  ;;  %1727 = vmatpush1.msra.mxu0 %v2377_v24  ;;  %v3606_v1 = vsel %vm1489_vm11, %v1506_v30, %v1514_v48  ;;  %v1004_v13 = vrot.slane %v958_v45, 1  ;;  %v1470_v14 = vld [vmem:[#allocation2 + $0x40] sm:$0x3]  ;;  %v1007_v15 = vsel %vm979_vm8, %v999_v20, %v1006_v55  ;;  %v2340_v19 = vld [vmem:[%s4217_s6 + $0x568] sm:$0xff]  ;;  %v1512_v22 = vrot.slane %v3396_v0, 2  ;;  %v2338_v26 = vld [vmem:[%s4217_s6 + $0x558] sm:$0xff] }
 0x3e4   :  { %1364 = vmatmul.mubr.f32.gmra.mxu0 %v871_v44  ;;  %1175 = vmatprep.mubr.f32.mxu1 %v1000_v49  ;;  %v1498_v47 = vsel %vm1489_vm11, %v1496_v61, %v1497_v62  ;;  %v1503_v18 = vrot.slane %v1470_v14, 2  ;;  %v2339_v24 = vld [vmem:[%s4217_s6 + $0x560] sm:$0xff]  ;;  %v1476_v25 = vld [vmem:[#allocation2 + $0x88] sm:$0x3]  ;;  %v2337_v27 = vld [vmem:[%s4217_s6 + $0x550] sm:$0xff]  ;;  %v1494_v6 = vrot.slane %v3528_v51, 2 }
 0x3e5   :  { %1369 = vmatprep.mubr.f32.mxu0 %v3534_v54  ;;  %1404 = vmatprep.subr.mxu1 %v944_v37  ;;  %v1005_v17 = vsel %vm979_vm8, %v996_v12, %v1004_v13  ;;  %v867_v54 = vld [vmem:[#allocation2 + $0x10] sm:$0xff]  ;;  %v2336_v28 = vld [vmem:[%s4217_s6 + $0x548] sm:$0xff]  ;;  %v1518_v30 = vrot.slane %v1476_v25, 2  ;;  %v2335_v32 = vld [vmem:[%s4217_s6 + $0x540] sm:$0xff] }
 0x3e6   :  { %1728 = vmatprep.subr.mxu0 %v2376_v38  ;;  %1405 = vmatpush1.msra.mxu1 %v943_v60  ;;  %v1504_v20 = vsel %vm1489_vm11, %v1497_v62, %v1503_v18  ;;  %v2541_v31 = vld [vmem:[#allocation2 + $0x28] sm:$0xff]  ;;  %v2334_v33 = vld [vmem:[%s4217_s6 + $0x538] sm:$0xff]  ;;  %v2333_v8 = vld [vmem:[%s4217_s6 + $0x530] sm:$0xff] }
 0x3e7   :  { %1176 = vmatmul.mubr.f32.gmra.mxu1 %v997_v2  ;;  %1729 = vmatpush1.msra.mxu0 %v2375_v56  ;;  %v873_v34 = vld [vmem:[#allocation2 + $0x58] sm:$0xff]  ;;  %v1466_v35 = vld [vmem:[#allocation2 + $0x8] sm:$0xfc]  ;;  %v1519_v5 = vsel %vm1489_vm11, %v1512_v22, %v1518_v30  ;;  %v2331_v38 = vld [vmem:[%s4217_s6 + $0x520] sm:$0xff] }
 0x3e8   :  { %1370 = vmatmul.mubr.f32.gmra.mxu0 %v3531_v52  ;;  %1181 = vmatprep.mubr.f32.mxu1 %v1007_v15  ;;  %v1473_v52 = vld [vmem:[#allocation2 + $0x58] sm:$0xfc]  ;;  %v2332_v37 = vld [vmem:[%s4217_s6 + $0x528] sm:$0xff]  ;;  %v1493_v9 = vrot.slane %v1466_v35, 2  ;;  %v2329_v41 = vld [vmem:[%s4217_s6 + $0x510] sm:$0xff] }
 0x3e9   :  { %1406 = vmatprep.subr.mxu1 %v942_v23  ;;  %1762 = vmatprep.mubr.f32.mxu0 %v3323_v36  ;;  %v1511_v21 = vrot.slane %v1473_v52, 2  ;;  %v2330_v40 = vld [vmem:[%s4217_s6 + $0x518] sm:$0xff]  ;;  %v2328_v42 = vld [vmem:[%s4217_s6 + $0x508] sm:$0xff]  ;;  %v2327_v7 = vld [vmem:[%s4217_s6 + $0x500] sm:$0xff] }
 0x3ea   :  { %1407 = vmatpush1.msra.mxu1 %v941_v39  ;;  %v2326_v43 = vld [vmem:[%s4217_s6 + $0x4f8] sm:$0xff]  ;;  %v2325_v16 = vld [vmem:[%s4217_s6 + $0x4f0] sm:$0xff]  ;;  %v2323_v44 = vld [vmem:[%s4217_s6 + $0x4e0] sm:$0xff] }
 0x3eb   :  { %1182 = vmatmul.mubr.f32.gmra.mxu1 %v1005_v17  ;;  %1609 = vmatprep.subr.mxu1 %v2342_v11  ;;  %v1513_v29 = vsel %vm1489_vm11, %v1511_v21, %v1512_v22  ;;  %v2322_v12 = vld [vmem:[%s4217_s6 + $0x4d8] sm:$0xff]  ;;  %v2321_v45 = vld [vmem:[%s4217_s6 + $0x4d0] sm:$0xff]  ;;  %v2320_v3 = vld [vmem:[%s4217_s6 + $0x4c8] sm:$0xff] }
 0x3ec   :  { %1440 = vmatprep.mubr.f32.mxu1 %v3323_v36  ;;  %2383 = vmatmul.mubr.msk.f32.vlgmr.msra.gmra.mxu0 %vm585_vm1, %v1498_v47  ;;  %v2319_v48 = vld [vmem:[%s4217_s6 + $0x4c0] sm:$0xff]  ;;  %v2318_v49 = vld [vmem:[%s4217_s6 + $0x4b8] sm:$0xff]  ;;  %v2317_v55 = vld [vmem:[%s4217_s6 + $0x4b0] sm:$0xff] }
 0x3ed   :  { %1768 = vmatprep.mubr.f32.mxu0 %v3323_v36  ;;  %v2316_v56 = vld [vmem:[%s4217_s6 + $0x4a8] sm:$0xff]  ;;  %v2315_v60 = vld [vmem:[%s4217_s6 + $0x4a0] sm:$0xff]  ;;  %v2314_v61 = vld [vmem:[%s4217_s6 + $0x498] sm:$0xff] }
 0x3ee   :  { %v2313_v62 = vld [vmem:[%s4217_s6 + $0x490] sm:$0xff]  ;;  %v2312_v2 = vld [vmem:[%s4217_s6 + $0x488] sm:$0xff]  ;;  %v2311_v23 = vld [vmem:[%s4217_s6 + $0x480] sm:$0xff] }
 0x3ef   :  { %2307 = vmatmul.mubr.msk.f32.vlgmr.msra.gmra.mxu1 %vm585_vm1, %v867_v54  ;;  %v2374_v13 = vld [vmem:[%s4217_s6 + $0x678] sm:$0xff]  ;;  %v2373_v39 = vld [vmem:[%s4217_s6 + $0x670] sm:$0xff]  ;;  %v2372_v14 = vld [vmem:[%s4217_s6 + $0x668] sm:$0xff] }
 0x3f0   :  { %1610 = vmatpush1.msra.mxu1 %v2341_v50  ;;  %1446 = vmatprep.mubr.f32.mxu1 %v3323_v36  ;;  %v2371_v15 = vld [vmem:[%s4217_s6 + $0x660] sm:$0xff]  ;;  %v2370_v11 = vld [vmem:[%s4217_s6 + $0x658] sm:$0xff]  ;;  %v2369_v47 = vld [vmem:[%s4217_s6 + $0x650] sm:$0xff] }
 0x3f1   :  { %1611 = vmatprep.subr.mxu1 %v2340_v19  ;;  %2384 = vmatmul.mubr.msk.f32.gmra.mxu0 %vm585_vm1, %v1504_v20  ;;  %v2368_v17 = vld [vmem:[%s4217_s6 + $0x648] sm:$0xff]  ;;  %v2367_v18 = vld [vmem:[%s4217_s6 + $0x640] sm:$0xff]  ;;  %v2366_v52 = vld [vmem:[%s4217_s6 + $0x638] sm:$0xff] }
 0x3f2   :  { %1612 = vmatpush1.msra.mxu1 %v2339_v24  ;;  %1774 = vmatprep.mubr.f32.mxu0 %v3323_v36  ;;  %v2365_v54 = vld [vmem:[%s4217_s6 + $0x630] sm:$0xff]  ;;  %v2364_v50 = vld [vmem:[%s4217_s6 + $0x628] sm:$0xff]  ;;  %v2363_v19 = vld [vmem:[%s4217_s6 + $0x620] sm:$0xff] }
 0x3f3   :  { %1613 = vmatprep.subr.mxu1 %v2338_v26  ;;  %2308 = vmatmul.mubr.msk.f32.gmra.mxu1 %vm585_vm1, %v2541_v31  ;;  %v2362_v20 = vld [vmem:[%s4217_s6 + $0x618] sm:$0xff]  ;;  %v2361_v21 = vld [vmem:[%s4217_s6 + $0x610] sm:$0xff]  ;;  %v2360_v22 = vld [vmem:[%s4217_s6 + $0x608] sm:$0xff] }
 0x3f4   :  { %1614 = vmatpush1.msra.mxu1 %v2337_v27  ;;  %1452 = vmatprep.mubr.f32.mxu1 %v3323_v36  ;;  %v2359_v24 = vld [vmem:[%s4217_s6 + $0x600] sm:$0xff]  ;;  %v2358_v25 = vld [vmem:[%s4217_s6 + $0x5f8] sm:$0xff]  ;;  %v2357_v26 = vld [vmem:[%s4217_s6 + $0x5f0] sm:$0xff] }
 0x3f5   :  { %1615 = vmatprep.subr.mxu1 %v2336_v28  ;;  %2385 = vmatmul.mubr.msk.f32.gmra.mxu0 %vm585_vm1, %v1513_v29  ;;  %v2356_v27 = vld [vmem:[%s4217_s6 + $0x5e8] sm:$0xff]  ;;  %v2355_v28 = vld [vmem:[%s4217_s6 + $0x5e0] sm:$0xff]  ;;  %v2354_v29 = vld [vmem:[%s4217_s6 + $0x5d8] sm:$0xff] }
 0x3f6   :  { %1616 = vmatpush1.msra.mxu1 %v2335_v32  ;;  %1780 = vmatprep.mubr.f32.mxu0 %v3323_v36  ;;  %v2353_v30 = vld [vmem:[%s4217_s6 + $0x5d0] sm:$0xff]  ;;  %v2352_v31 = vld [vmem:[%s4217_s6 + $0x5c8] sm:$0xff]  ;;  %v2351_v32 = vld [vmem:[%s4217_s6 + $0x5c0] sm:$0xff] }
 0x3f7   :  { %1617 = vmatprep.subr.mxu1 %v2334_v33  ;;  %2309 = vmatmul.mubr.msk.f32.gmra.mxu1 %vm585_vm1, %v873_v34  ;;  %v2350_v33 = vld [vmem:[%s4217_s6 + $0x5b8] sm:$0xff]  ;;  %v2349_v34 = vld [vmem:[%s4217_s6 + $0x5b0] sm:$0xff]  ;;  %v2348_v35 = vld [vmem:[%s4217_s6 + $0x5a8] sm:$0xff] }
 0x3f8   :  { %1618 = vmatpush1.msra.mxu1 %v2333_v8  ;;  %1458 = vmatprep.mubr.f32.mxu1 %v3323_v36  ;;  %v1495_v36 = vsel %vm1489_vm11, %v1493_v9, %v1494_v6  ;;  %v2347_v8 = vld [vmem:[%s4217_s6 + $0x5a0] sm:$0xff]  ;;  %v2344_v9 = vld [vmem:[%s4217_s6 + $0x588] sm:$0xff]  ;;  %v3856_v51 = vld [vmem:[%s4220_s10 + $0x78] sm:$0xff] }
 0x3f9   :  { %1619 = vmatprep.subr.mxu1 %v2332_v37  ;;  %2386 = vmatmul.mubr.msk.f32.gmra.mxu0 %vm585_vm1, %v1519_v5  ;;  %v2346_v37 = vld [vmem:[%s4217_s6 + $0x598] sm:$0xff] }
 0x3fa   :  { %1620 = vmatpush1.msra.mxu1 %v2331_v38  ;;  %v1469_v5 = vld [vmem:[#allocation2 + $0x38] sm:$0x3]  ;;  %v2345_v38 = vld [vmem:[%s4217_s6 + $0x590] sm:$0xff] }
 0x3fb   :  { %1621 = vmatprep.subr.mxu1 %v2330_v40  ;;  %2310 = vmatmul.mubr.msk.f32.gmra.mxu1 %vm585_vm1, %v3396_v0  ;;  %v2324_v0 = vld [vmem:[%s4217_s6 + $0x4e8] sm:$0xff]  ;;  %v2343_v40 = vld [vmem:[%s4217_s6 + $0x580] sm:$0xff] }
 0x3fc   :  { %1622 = vmatpush1.msra.mxu1 %v2329_v41  ;;  %1673 = vmatprep.mubr.f32.mxu1 %v1495_v36  ;;  %v1501_v41 = vrot.slane %v1469_v5, 2  ;;  %v3850_v36 = vld [vmem:[%s4220_s10 + $0xf8] sm:$0xff] }
 0x3fd   :  { %1623 = vmatprep.subr.mxu1 %v2328_v42  ;;  %2457 = vmatprep.subr.mxu0 %v3850_v36 }
 0x3fe   :  { %1624 = vmatpush1.msra.mxu1 %v2327_v7  ;;  %v1502_v42 = vsel %vm1489_vm11, %v1494_v6, %v1501_v41  ;;  %2458 = vmatpush3.msra.mxu0 %v3856_v51  ;;  %v3898_v6 = vld [vmem:[%s4220_s10 + $0xd8] sm:$0xff] }
 0x3ff   :  { %1625 = vmatprep.subr.mxu1 %v2326_v43  ;;  %v3904_v7 = vld [vmem:[%s4220_s10 + $0x58] sm:$0xff]  ;;  %v3910_v43 = vld [vmem:[%s4220_s10 + $0xd0] sm:$0xff] }
 0x400   :  { %1626 = vmatpush1.msra.mxu1 %v2325_v16  ;;  %4250 = vst [vmem:[#allocation4_spill] sm:$0xff] %v3910_v43  ;;  %v3916_v16 = vld [vmem:[%s4220_s10 + $0x50] sm:$0xff] }
 0x401   :  { %1627 = vmatprep.subr.mxu1 %v2324_v0  ;;  %4251 = vst [vmem:[#allocation5_spill] sm:$0xff] %v3916_v16  ;;  %v3922_v0 = vld [vmem:[%s4220_s10 + $0xc8] sm:$0xff] }
 0x402   :  { %1628 = vmatpush1.msra.mxu1 %v2323_v44  ;;  %4252 = vst [vmem:[#allocation6_spill] sm:$0xff] %v3922_v0  ;;  %v3928_v44 = vld [vmem:[%s4220_s10 + $0x48] sm:$0xff] }
 0x403   :  { %1629 = vmatprep.subr.mxu1 %v2322_v12  ;;  %4253 = vst [vmem:[#allocation7_spill] sm:$0xff] %v3928_v44  ;;  %v3934_v12 = vld [vmem:[%s4220_s10 + $0xc0] sm:$0xff] }
 0x404   :  { %1630 = vmatpush1.msra.mxu1 %v2321_v45  ;;  %4254 = vst [vmem:[#allocation8_spill] sm:$0xff] %v3934_v12  ;;  %v3940_v45 = vld [vmem:[%s4220_s10 + $0x40] sm:$0xff] }
 0x405   :  { %1631 = vmatprep.subr.mxu1 %v2320_v3  ;;  %4255 = vst [vmem:[#allocation9_spill] sm:$0xff] %v3940_v45  ;;  %v3946_v3 = vld [vmem:[%s4220_s10 + $0xb8] sm:$0xff] }
 0x406   :  { %1632 = vmatpush1.msra.mxu1 %v2319_v48  ;;  %4256 = vst [vmem:[#allocation10_spill] sm:$0xff] %v3946_v3  ;;  %v3952_v48 = vld [vmem:[%s4220_s10 + $0x38] sm:$0xff] }
 0x407   :  { %1633 = vmatprep.subr.mxu1 %v2318_v49  ;;  %4257 = vst [vmem:[#allocation11_spill] sm:$0xff] %v3952_v48  ;;  %v3958_v49 = vld [vmem:[%s4220_s10 + $0xb0] sm:$0xff] }
 0x408   :  { %1634 = vmatpush1.msra.mxu1 %v2317_v55  ;;  %4258 = vst [vmem:[#allocation12_spill] sm:$0xff] %v3958_v49  ;;  %v3964_v55 = vld [vmem:[%s4220_s10 + $0x30] sm:$0xff] }
 0x409   :  { %1635 = vmatprep.subr.mxu1 %v2316_v56  ;;  %4259 = vst [vmem:[#allocation13_spill] sm:$0xff] %v3964_v55  ;;  %v3969_v56 = vld [vmem:[%s4220_s10 + $0xa8] sm:$0xff] }
 0x40a   :  { %1636 = vmatpush1.msra.mxu1 %v2315_v60  ;;  %4260 = vst [vmem:[#allocation14_spill] sm:$0xff] %v3969_v56  ;;  %v3974_v60 = vld [vmem:[%s4220_s10 + $0x28] sm:$0xff] }
 0x40b   :  { %1637 = vmatprep.subr.mxu1 %v2314_v61  ;;  %4261 = vst [vmem:[#allocation15_spill] sm:$0xff] %v3974_v60  ;;  %v3980_v61 = vld [vmem:[%s4220_s10 + $0xa0] sm:$0xff] }
 0x40c   :  { %1638 = vmatpush1.msra.mxu1 %v2313_v62  ;;  %4262 = vst [vmem:[#allocation16_spill] sm:$0xff] %v3980_v61  ;;  %v3986_v62 = vld [vmem:[%s4220_s10 + $0x20] sm:$0xff] }
 0x40d   :  { %1639 = vmatprep.subr.mxu1 %v2312_v2  ;;  %4263 = vst [vmem:[#allocation17_spill] sm:$0xff] %v3986_v62  ;;  %v3992_v2 = vld [vmem:[%s4220_s10 + $0x98] sm:$0xff] }
 0x40e   :  { %1640 = vmatpush1.msra.mxu1 %v2311_v23  ;;  %4264 = vst [vmem:[#allocation18_spill] sm:$0xff] %v3992_v2  ;;  %v3998_v23 = vld [vmem:[%s4220_s10 + $0x18] sm:$0xff] }
 0x40f   :  { %1641 = vmatprep.subr.mxu1 %v2374_v13  ;;  %4265 = vst [vmem:[#allocation19_spill] sm:$0xff] %v3998_v23  ;;  %v4004_v13 = vld [vmem:[%s4220_s10 + $0x90] sm:$0xff] }
 0x410   :  { %1642 = vmatpush2.msra.mxu1 %v2373_v39  ;;  %4266 = vst [vmem:[#allocation20_spill] sm:$0xff] %v4004_v13  ;;  %v4010_v39 = vld [vmem:[%s4220_s10 + $0x10] sm:$0xff] }
 0x411   :  { %1643 = vmatprep.subr.mxu1 %v2372_v14  ;;  %4267 = vst [vmem:[#allocation21_spill] sm:$0xff] %v4010_v39  ;;  %v4016_v14 = vld [vmem:[%s4220_s10 + $0x88] sm:$0xff] }
 0x412   :  { %1644 = vmatpush2.msra.mxu1 %v2371_v15  ;;  %4268 = vst [vmem:[#allocation22_spill] sm:$0xff] %v4016_v14  ;;  %v4022_v15 = vld [vmem:[%s4220_s10 + $0x8] sm:$0xff] }
 0x413   :  { %1645 = vmatprep.subr.mxu1 %v2370_v11  ;;  %4269 = vst [vmem:[#allocation23_spill] sm:$0xff] %v4022_v15  ;;  %v4028_v11 = vld [vmem:[%s4220_s10 + $0x80] sm:$0xff] }
 0x414   :  { %1646 = vmatpush2.msra.mxu1 %v2369_v47  ;;  %4270 = vst [vmem:[#allocation24_spill] sm:$0xff] %v4028_v11  ;;  %v4034_v47 = vld [vmem:[%s4220_s10] sm:$0xff] }
 0x415   :  { %1647 = vmatprep.subr.mxu1 %v2368_v17  ;;  %4271 = vst [vmem:[#allocation25_spill] sm:$0xff] %v4034_v47  ;;  %v1254_v17 = vpop.f32.mrf.mxu0 }
 0x416   :  { %1648 = vmatpush2.msra.mxu1 %v2367_v18 }
 0x417   :  { %1649 = vmatprep.subr.mxu1 %v2366_v52  ;;  %v1256_v18 = vpop.f32.mrf.mxu0 }
 0x418   :  { %1650 = vmatpush2.msra.mxu1 %v2365_v54 }
 0x419   :  { %1651 = vmatprep.subr.mxu1 %v2364_v50  ;;  %v1260_v52 = vpop.f32.mrf.mxu0 }
 0x41a   :  { %1652 = vmatpush2.msra.mxu1 %v2363_v19 }
 0x41b   :  { %1653 = vmatprep.subr.mxu1 %v2362_v20  ;;  %v1262_v54 = vpop.f32.mrf.mxu0 }
 0x41c   :  { %1654 = vmatpush2.msra.mxu1 %v2361_v21 }
 0x41d   :  { %1655 = vmatprep.subr.mxu1 %v2360_v22  ;;  %v1266_v19 = vpop.f32.mrf.mxu0 }
 0x41e   :  { %1656 = vmatpush2.msra.mxu1 %v2359_v24 }
 0x41f   :  { %1657 = vmatprep.subr.mxu1 %v2358_v25  ;;  %v1268_v21 = vpop.f32.mrf.mxu0 }
 0x420   :  { %1658 = vmatpush2.msra.mxu1 %v2357_v26 }
 0x421   :  { %1659 = vmatprep.subr.mxu1 %v2356_v27  ;;  %v1272_v24 = vpop.f32.mrf.mxu0 }
 0x422   :  { %1660 = vmatpush2.msra.mxu1 %v2355_v28 }
 0x423   :  { %1661 = vmatprep.subr.mxu1 %v2354_v29  ;;  %v1274_v26 = vpop.f32.mrf.mxu0 }
 0x424   :  { %1662 = vmatpush2.msra.mxu1 %v2353_v30 }
 0x425   :  { %1663 = vmatprep.subr.mxu1 %v2352_v31 }
 0x426   :  { %1664 = vmatpush2.msra.mxu1 %v2351_v32 }
 0x427   :  { %1665 = vmatprep.subr.mxu1 %v2350_v33 }
 0x428   :  { %1666 = vmatpush2.msra.mxu1 %v2349_v34 }
 0x429   :  { %1667 = vmatprep.subr.mxu1 %v2348_v35 }
 0x42a   :  { %1668 = vmatpush2.msra.mxu1 %v2347_v8 }
 0x42b   :  { %1669 = vmatprep.subr.mxu1 %v2346_v37 }
 0x42c   :  { %1670 = vmatpush2.msra.mxu1 %v2345_v38 }
 0x42d   :  { %1671 = vmatprep.subr.mxu1 %v2344_v9 }
 0x42e   :  { %1672 = vmatpush2.msra.mxu1 %v2343_v40 }
 0x42f   :  { %1674 = vmatmul.mubr.f32.vlgmr.msra.gmra.mxu1 %v3579_v10  ;;  %v3862_v10 = vld [vmem:[%s4220_s10 + $0xf0] sm:$0xff] }
 0x430   :  { %1679 = vmatprep.mubr.f32.mxu1 %v1502_v42  ;;  %2459 = vmatprep.subr.mxu0 %v3862_v10 }
 0x433   :  { %1680 = vmatmul.mubr.f32.gmra.mxu1 %v3583_v46  ;;  %v3868_v46 = vld [vmem:[%s4220_s10 + $0x70] sm:$0xff] }
 0x434   :  { %1685 = vmatprep.mubr.f32.mxu1 %v3592_v58  ;;  %2460 = vmatpush3.msra.mxu0 %v3868_v46  ;;  %v3874_v58 = vld [vmem:[%s4220_s10 + $0xe8] sm:$0xff] }
 0x435   :  { %2461 = vmatprep.subr.mxu0 %v3874_v58 }
 0x437   :  { %1686 = vmatmul.mubr.f32.gmra.mxu1 %v3595_v59  ;;  %v3880_v59 = vld [vmem:[%s4220_s10 + $0x68] sm:$0xff] }
 0x438   :  { %1691 = vmatprep.mubr.f32.mxu1 %v3603_v63  ;;  %2462 = vmatpush3.msra.mxu0 %v3880_v59  ;;  %v3886_v63 = vld [vmem:[%s4220_s10 + $0xe0] sm:$0xff] }
 0x439   :  { %2463 = vmatprep.subr.mxu0 %v3886_v63 }
 0x43b   :  { %1692 = vmatmul.mubr.f32.gmra.mxu1 %v3606_v1  ;;  %v3892_v1 = vld [vmem:[%s4220_s10 + $0x60] sm:$0xff] }
 0x43c   :  { %2464 = vmatpush3.msra.mxu0 %v3892_v1 }
 0x43d   :  { %2465 = vmatprep.subr.mxu0 %v3898_v6 }
 0x43e   :  { %2466 = vmatpush3.msra.mxu0 %v3904_v7 }
 0x43f   :  { %2467 = vmatprep.subr.mxu0 %v3910_v43 }
 0x440   :  { %2468 = vmatpush3.msra.mxu0 %v3916_v16  ;;  %v1795_v16 = vld [vmem:[%s4221_s7] sm:$0x3] }
 0x441   :  { %2469 = vmatprep.subr.mxu0 %v3922_v0 }
 0x442   :  { %2470 = vmatpush3.msra.mxu0 %v3928_v44 }
 0x443   :  { %2471 = vmatprep.subr.mxu0 %v3934_v12 }
 0x444   :  { %2472 = vmatpush3.msra.mxu0 %v3940_v45 }
 0x445   :  { %2473 = vmatprep.subr.mxu0 %v3946_v3 }
 0x446   :  { %2474 = vmatpush3.msra.mxu0 %v3952_v48 }
 0x447   :  { %2475 = vmatprep.subr.mxu0 %v3958_v49 }
 0x448   :  { %2476 = vmatpush3.msra.mxu0 %v3964_v55 }
 0x449   :  { %2477 = vmatprep.subr.mxu0 %v3969_v56 }
 0x44a   :  { %2478 = vmatpush3.msra.mxu0 %v3974_v60 }
 0x44b   :  { %2479 = vmatprep.subr.mxu0 %v3980_v61 }
 0x44c   :  { %2480 = vmatpush3.msra.mxu0 %v3986_v62 }
 0x44d   :  { %2481 = vmatprep.subr.mxu0 %v3992_v2 }
 0x44e   :  { %2482 = vmatpush3.msra.mxu0 %v3998_v23 }
 0x44f   :  { %2483 = vmatprep.subr.mxu0 %v4004_v13 }
 0x450   :  { %2484 = vmatpush3.msra.mxu0 %v4010_v39 }
 0x451   :  { %2485 = vmatprep.subr.mxu0 %v4016_v14 }
 0x452   :  { %2486 = vmatpush3.msra.mxu0 %v4022_v15 }
 0x453   :  { %2487 = vmatprep.subr.mxu0 %v4028_v11 }
 0x454   :  { %2488 = vmatpush3.msra.mxu0 %v4034_v47 }
 0x455   :  { %2492 = vmatprep.subr.mxu0 %v3850_v36 }
 0x49b   :  { %v1353_v28 = vpop.f32.mrf.mxu0 }
 0x49d   :  { %v1355_v30 = vpop.f32.mrf.mxu0 }
 0x49f   :  { %v1165_v50 = vpop.f32.mrf.mxu1  ;;  %v1359_v32 = vpop.f32.mrf.mxu0 }
 0x4a0   :  { %v1255_v23 = vadd.f32 %v1254_v17, %v1165_v50 }
 0x4a1   :  { %v1167_v20 = vpop.f32.mrf.mxu1  ;;  %v1361_v34 = vpop.f32.mrf.mxu0 }
 0x4a2   :  { %v1257_v61 = vadd.f32 %v1256_v18, %v1167_v20  ;;  %v1354_v48 = vadd.f32 %v1353_v28, %v1255_v23 }
 0x4a3   :  { %v1171_v22 = vpop.f32.mrf.mxu1 }
 0x4a4   :  { %v1365_v8 = vpop.f32.mrf.mxu0  ;;  %v1261_v13 = vadd.f32 %v1260_v52, %v1171_v22  ;;  %v1356_v50 = vadd.f32 %v1355_v30, %v1257_v61 }
 0x4a5   :  { %v1173_v25 = vpop.f32.mrf.mxu1 }
 0x4a6   :  { %v1367_v5 = vpop.f32.mrf.mxu0  ;;  %v1263_v62 = vadd.f32 %v1262_v54, %v1173_v25  ;;  %v1360_v49 = vadd.f32 %v1359_v32, %v1261_v13 }
 0x4a7   :  { %v1177_v27 = vpop.f32.mrf.mxu1 }
 0x4a8   :  { %v1371_v9 = vpop.f32.mrf.mxu0  ;;  %v1267_v55 = vadd.f32 %v1266_v19, %v1177_v27  ;;  %v1362_v0 = vadd.f32 %v1361_v34, %v1263_v62 }
 0x4a9   :  { %v1179_v29 = vpop.f32.mrf.mxu1 }
 0x4aa   :  { %v1373_v41 = vpop.f32.mrf.mxu0  ;;  %v1269_v12 = vadd.f32 %v1268_v21, %v1179_v29  ;;  %v1366_v19 = vadd.f32 %v1365_v8, %v1267_v55 }
 0x4ab   :  { %v1183_v31 = vpop.f32.mrf.mxu1 }
 0x4ac   :  { %v1764_v36 = vpop.f32.mrf.mxu0  ;;  %v1273_v52 = vadd.f32 %v1272_v24, %v1183_v31  ;;  %v1368_v28 = vadd.f32 %v1367_v5, %v1269_v12 }
 0x4ad   :  { %v1185_v33 = vpop.f32.mrf.mxu1 }
 0x4ae   :  { %v1766_v47 = vpop.f32.mrf.mxu0 }
 0x4af   :  { %v1442_v35 = vpop.f32.mrf.mxu1 }
 0x4b0   :  { %v1443_v17 = vadd.f32 %v1442_v35, %v1354_v48 }
 0x4b1   :  { %v1444_v37 = vpop.f32.mrf.mxu1  ;;  %v1770_v15 = vpop.f32.mrf.mxu0 }
 0x4b2   :  { %v1445_v25 = vadd.f32 %v1444_v37, %v1356_v50 }
 0x4b3   :  { %v1448_v38 = vpop.f32.mrf.mxu1  ;;  %v1772_v39 = vpop.f32.mrf.mxu0 }
 0x4b4   :  { %v1449_v44 = vadd.f32 %v1448_v38, %v1360_v49  ;;  %v1800_v49 = vrot.slane %v1795_v16, %v2940_v53 }
 0x4b5   :  { %v1450_v40 = vpop.f32.mrf.mxu1  ;;  %v1776_v56 = vpop.f32.mrf.mxu0 }
 0x4b6   :  { %v1451_v22 = vadd.f32 %v1450_v40, %v1362_v0 }
 0x4b7   :  { %v1454_v42 = vpop.f32.mrf.mxu1  ;;  %v1778_v20 = vpop.f32.mrf.mxu0 }
 0x4b8   :  { %v1455_v27 = vadd.f32 %v1454_v42, %v1366_v19 }
 0x4b9   :  { %v1456_v4 = vpop.f32.mrf.mxu1 }
 0x4ba   :  { %v1457_v0 = vadd.f32 %v1456_v4, %v1368_v28  ;;  %v4286_v28 = vld [vmem:[#allocation18_spill] sm:$0xff] }
 0x4bb   :  { %v1460_v11 = vpop.f32.mrf.mxu1 }
 0x4bd   :  { %v1462_v14 = vpop.f32.mrf.mxu1 }
 0x4ef   :  { %v1675_v2 = vpop.f32.mrf.mxu1 }
 0x4f0   :  { %v1765_v3 = vadd.f32 %v1764_v36, %v1675_v2  ;;  %v1275_v2 = vadd.f32 %v1274_v26, %v1185_v33 }
 0x4f1   :  { %v1677_v60 = vpop.f32.mrf.mxu1 }
 0x4f2   :  { %v1767_v54 = vadd.f32 %v1766_v47, %v1677_v60  ;;  %v1787_v21 = vadd.f32 %v1765_v3, %v1443_v17  ;;  %v1804_v60 = vrot.slane %v1795_v16, %v2946_v57  ;;  %v1782_v47 = vpop.f32.mrf.mxu0  ;;  %v1374_v3 = vadd.f32 %v1373_v41, %v1275_v2 }
 0x4f3   :  { %v1681_v45 = vpop.f32.mrf.mxu1 }
 0x4f4   :  { %v1771_v43 = vadd.f32 %v1770_v15, %v1681_v45  ;;  %v1372_v15 = vadd.f32 %v1371_v9, %v1273_v52  ;;  %v1788_v48 = vadd.f32 %v1767_v54, %v1445_v25  ;;  %v4047_v24 = vadd.f32 %v1800_v49, %v1787_v21  ;;  %v1784_v33 = vpop.f32.mrf.mxu0  ;;  %v4272_v25 = vld [vmem:[#allocation4_spill] sm:$0xff]  ;;  %v4273_v21 = vld [vmem:[#allocation5_spill] sm:$0xff] }
 0x4f5   :  { %v1683_v18 = vpop.f32.mrf.mxu1  ;;  %v1463_v32 = vadd.f32 %v1462_v14, %v1374_v3 }
 0x4f6   :  { %v1789_v13 = vadd.f32 %v1771_v43, %v1449_v44  ;;  %v1773_v23 = vadd.f32 %v1772_v39, %v1683_v18  ;;  %v1461_v39 = vadd.f32 %v1460_v11, %v1372_v15  ;;  %v4053_v16 = vadd.f32 %v1804_v60, %v1788_v48  ;;  %v4289_v15 = vld [vmem:[#allocation21_spill] sm:$0xff]  ;;  %v4290_v48 = vld [vmem:[#allocation22_spill] sm:$0xff] }
 0x4f7   :  { %v1687_v62 = vpop.f32.mrf.mxu1 }
 0x4f8   :  { %v1790_v29 = vadd.f32 %v1773_v23, %v1451_v22  ;;  %v1777_v45 = vadd.f32 %v1776_v56, %v1687_v62  ;;  %v4045_v55 = vadd.f32 %v1800_v49, %v1789_v13  ;;  %v4284_v62 = vld [vmem:[#allocation16_spill] sm:$0xff] }
 0x4f9   :  { %v1689_v61 = vpop.f32.mrf.mxu1 }
 0x4fa   :  { %v1791_v43 = vadd.f32 %v1777_v45, %v1455_v27  ;;  %v1779_v44 = vadd.f32 %v1778_v20, %v1689_v61  ;;  %v4049_v30 = vadd.f32 %v1804_v60, %v1790_v29  ;;  %v1849_v34 = vadd.f32 %v4045_v55, %v4047_v24  ;;  %v4285_v27 = vld [vmem:[#allocation17_spill] sm:$0xff]  ;;  %v4287_v29 = vld [vmem:[#allocation19_spill] sm:$0xff]  ;;  %v4288_v45 = vld [vmem:[#allocation20_spill] sm:$0xff] }
 0x4fb   :  { %v1693_v26 = vpop.f32.mrf.mxu1  ;;  %v4292_v61 = vld [vmem:[#allocation24_spill] sm:$0xff] }
 0x4fc   :  { %v4051_v12 = vadd.f32 %v1800_v49, %v1791_v43  ;;  %v1792_v56 = vadd.f32 %v1779_v44, %v1457_v0  ;;  %v1783_v31 = vadd.f32 %v1782_v47, %v1693_v26  ;;  %v1858_v37 = vadd.f32 %v4049_v30, %v4053_v16  ;;  %v4293_v47 = vld [vmem:[#allocation25_spill] sm:$0xff] }
 0x4fd   :  { %v1695_v4 = vpop.f32.mrf.mxu1 }
 0x4fe   :  { %v4057_v35 = vadd.f32 %v1804_v60, %v1792_v56  ;;  %v1793_v11 = vadd.f32 %v1783_v31, %v1461_v39  ;;  %v1785_v8 = vadd.f32 %v1784_v33, %v1695_v4  ;;  %v1850_v5 = vadd.f32 %v1849_v34, %v4051_v12 }
 0x500   :  { %v4062_v38 = vadd.f32 %v1800_v49, %v1793_v11  ;;  %v1794_v9 = vadd.f32 %v1785_v8, %v1463_v32  ;;  %v1859_v14 = vadd.f32 %v1858_v37, %v4057_v35  ;;  %v4283_v49 = vld [vmem:[#allocation15_spill] sm:$0xff] }
 0x502   :  { %v1851_v40 = vadd.f32 %v1850_v5, %v4062_v38  ;;  %v4066_v41 = vadd.f32 %v1804_v60, %v1794_v9  ;;  %v4291_v60 = vld [vmem:[#allocation23_spill] sm:$0xff] }
 0x504   :  { %v1852_v42 = vrot.slane %v1851_v40, 4  ;;  %v1860_v36 = vadd.f32 %v1859_v14, %v4066_v41 }
 0x506   :  { %v1853_v52 = vadd.f32 %v1852_v42, %v1851_v40  ;;  %v1861_v17 = vrot.slane %v1860_v36, 4 }
 0x508   :  { %v1854_v50 = vrot.slane %v1853_v52, 2  ;;  %v1862_v54 = vadd.f32 %v1861_v17, %v1860_v36 }
 0x50a   :  { %v1855_v18 = vadd.f32 %v1854_v50, %v1853_v52  ;;  %v1863_v20 = vrot.slane %v1862_v54, 2 }
 0x50c   :  { %v1864_v22 = vadd.f32 %v1863_v20, %v1862_v54  ;;  %v1856_v19 = vrot.slane %v1855_v18, 1 }
 0x50e   :  { %v1865_v13 = vrot.slane %v1864_v22, 1  ;;  %v1857_v2 = vadd.f32 %v1856_v19, %v1855_v18 }
 0x510   :  { %v1866_v23 = vadd.f32 %v1865_v13, %v1864_v22 }
 0x512   :  { %1931 = vmatprep.mubr.f32.mxu0 %v1866_v23 }
 0x513   :  { %1932 = vmatmul.mubr.f32.vlgmr.msra.gmra.mxu0 %v1857_v2 }
 0x514   :  { %2493 = vmatpush3.msra.mxu0 %v3856_v51  ;;  %v4274_v51 = vld [vmem:[#allocation6_spill] sm:$0xff] }
 0x515   :  { %2494 = vmatprep.subr.mxu0 %v3862_v10  ;;  %v4275_v10 = vld [vmem:[#allocation7_spill] sm:$0xff] }
 0x516   :  { %2495 = vmatpush3.msra.mxu0 %v3868_v46  ;;  %v4276_v46 = vld [vmem:[#allocation8_spill] sm:$0xff] }
 0x517   :  { %2496 = vmatprep.subr.mxu0 %v3874_v58  ;;  %v4277_v58 = vld [vmem:[#allocation9_spill] sm:$0xff] }
 0x518   :  { %2497 = vmatpush3.msra.mxu0 %v3880_v59  ;;  %v4278_v59 = vld [vmem:[#allocation10_spill] sm:$0xff] }
 0x519   :  { %2498 = vmatprep.subr.mxu0 %v3886_v63  ;;  %v4279_v63 = vld [vmem:[#allocation11_spill] sm:$0xff] }
 0x51a   :  { %2499 = vmatpush3.msra.mxu0 %v3892_v1  ;;  %v4280_v1 = vld [vmem:[#allocation12_spill] sm:$0xff] }
 0x51b   :  { %2500 = vmatprep.subr.mxu0 %v3898_v6  ;;  %v4281_v6 = vld [vmem:[#allocation13_spill] sm:$0xff] }
 0x51c   :  { %2501 = vmatpush3.msra.mxu0 %v3904_v7  ;;  %v4282_v7 = vld [vmem:[#allocation14_spill] sm:$0xff] }
 0x51d   :  { %2502 = vmatprep.subr.mxu0 %v4272_v25 }
 0x51e   :  { %2503 = vmatpush3.msra.mxu0 %v4273_v21 }
 0x51f   :  { %2504 = vmatprep.subr.mxu0 %v4274_v51 }
 0x520   :  { %2505 = vmatpush3.msra.mxu0 %v4275_v10 }
 0x521   :  { %2506 = vmatprep.subr.mxu0 %v4276_v46 }
 0x522   :  { %2507 = vmatpush3.msra.mxu0 %v4277_v58 }
 0x523   :  { %2508 = vmatprep.subr.mxu0 %v4278_v59 }
 0x524   :  { %2509 = vmatpush3.msra.mxu0 %v4279_v63 }
 0x525   :  { %2510 = vmatprep.subr.mxu0 %v4280_v1 }
 0x526   :  { %2511 = vmatpush3.msra.mxu0 %v4281_v6 }
 0x527   :  { %2512 = vmatprep.subr.mxu0 %v4282_v7 }
 0x528   :  { %2513 = vmatpush3.msra.mxu0 %v4283_v49 }
 0x529   :  { %2514 = vmatprep.subr.mxu0 %v4284_v62 }
 0x52a   :  { %2515 = vmatpush3.msra.mxu0 %v4285_v27 }
 0x52b   :  { %2516 = vmatprep.subr.mxu0 %v4286_v28 }
 0x52c   :  { %2517 = vmatpush3.msra.mxu0 %v4287_v29 }
 0x52d   :  { %2518 = vmatprep.subr.mxu0 %v4288_v45 }
 0x52e   :  { %2519 = vmatpush3.msra.mxu0 %v4289_v15 }
 0x52f   :  { %2520 = vmatprep.subr.mxu0 %v4290_v48 }
 0x530   :  { %2521 = vmatpush3.msra.mxu0 %v4291_v60 }
 0x531   :  { %2522 = vmatprep.subr.mxu0 %v4292_v61 }
 0x532   :  { %2523 = vmatpush3.msra.mxu0 %v4293_v47 }
 0x5d3   :  { %v2489_v0 = vpop.f32.mrf.mxu0 }
 0x5d5   :  { %v2490_v43 = vpop.f32.mrf.mxu0 }
 0x5d6   :  { %v2491_v44 = vadd.f32 %v2490_v43, %v2489_v0 }
 0x5d8   :  { %v1937_v39 = vmul.f32 0.001953125, %v2491_v44 }
 0x5da   :  { %1942 = vrot.lane.b32.xlu1 %v1937_v39, %s2546_s19  ;;  %1939 = vrot.lane.b32.xlu0 %v1937_v39, %s2544_s17 }
 0x5de   :  { %1948 = vrot.lane.b32.xlu1 %v1937_v39, %s2545_s18  ;;  %1945 = vrot.lane.b32.xlu0 %v1937_v39, %s2543_s2 }
 0x5e2   :  { %1954 = vrot.lane.b32.xlu1 %v1937_v39, %s2547_s20  ;;  %1951 = vrot.lane.b32.xlu0 %v1937_v39, %s2548_s0 }
 0x5e6   :  { %1957 = vrot.lane.b32.xlu0 %v1937_v39, %s2549_s21 }
 0x64c   :  { %v1943_v3 = vpop.permute.xlu1 %1942  ;;  %v1940_v26 = vpop.permute.xlu0 %1939 }
 0x64d   :  { %v1960_v56 = vsel %vm583_vm2, %v1937_v39, %v1940_v26 }
 0x64e   :  { %v1961_v32 = vsel %vm585_vm1, %v1960_v56, %v1943_v3 }
 0x650   :  { %v1949_v31 = vpop.permute.xlu1 %1948  ;;  %v1946_v33 = vpop.permute.xlu0 %1945 }
 0x651   :  { %v1962_v4 = vsel %vm587_vm3, %v1961_v32, %v1946_v33 }
 0x652   :  { %v1963_v34 = vsel %vm589_vm4, %v1962_v4, %v1949_v31 }
 0x654   :  { %v1952_v11 = vpop.permute.xlu0 %1951  ;;  %v1955_v8 = vpop.permute.xlu1 %1954 }
 0x655   :  { %v1964_v37 = vsel %vm591_vm5, %v1963_v34, %v1952_v11  ;;  %v4294_v11 = vld [vmem:[#allocation3_spill] sm:$0xff] }
 0x656   :  { %v1965_v5 = vsel %vm593_vm6, %v1964_v37, %v1955_v8  ;;  %v1847_v37 = vld [vmem:[%s4222_s8] sm:$0x3] }
 0x658   :  { %v1958_v9 = vpop.permute.xlu0 %1957 }
 0x659   :  { %v1966_v14 = vsel %vm595_vm7, %v1965_v5, %v1958_v9  ;;  %v1848_v9 = vld [vmem:[%s4223_s9] sm:$0x3] }
 0x65a   :  { %v1970_v40 = vrot.slane %v1966_v14, %v2940_v53 }
 0x65c   :  { %v4116_v42 = vsub.f32 %v4053_v16, %v1970_v40  ;;  %v4119_v36 = vsub.f32 %v4049_v30, %v1970_v40  ;;  %v4122_v52 = vsub.f32 %v4057_v35, %v1970_v40  ;;  %v4125_v17 = vsub.f32 %v4047_v24, %v1970_v40 }
 0x65d   :  { %v4128_v50 = vsub.f32 %v4045_v55, %v1970_v40  ;;  %v4131_v54 = vsub.f32 %v4051_v12, %v1970_v40  ;;  %v4134_v18 = vsub.f32 %v4066_v41, %v1970_v40  ;;  %v4141_v35 = vsub.f32 %v4062_v38, %v1970_v40 }
 0x65e   :  { %v1980_v16 = vmul.f32 %v4116_v42, %v4116_v42  ;;  %v1982_v30 = vmul.f32 %v4119_v36, %v4119_v36  ;;  %v1979_v24 = vmul.f32 %v4125_v17, %v4125_v17  ;;  %v1984_v12 = vmul.f32 %v4122_v52, %v4122_v52 }
 0x65f   :  { %v1981_v55 = vmul.f32 %v4128_v50, %v4128_v50  ;;  %v1983_v20 = vmul.f32 %v4131_v54, %v4131_v54  ;;  %v1986_v19 = vmul.f32 %v4134_v18, %v4134_v18  ;;  %v1985_v38 = vmul.f32 %v4141_v35, %v4141_v35 }
 0x660   :  { %v1996_v41 = vadd.f32 %v1982_v30, %v1980_v16  ;;  %v2148_v40 = vrot.slane %v1848_v9, %v2940_v53  ;;  %v2152_v16 = vrot.slane %v1848_v9, %v2946_v57 }
 0x661   :  { %v1987_v22 = vadd.f32 %v1981_v55, %v1979_v24 }
 0x662   :  { %v1997_v13 = vadd.f32 %v1996_v41, %v1984_v12 }
 0x663   :  { %v1988_v23 = vadd.f32 %v1987_v22, %v1983_v20 }
 0x664   :  { %v1998_v2 = vadd.f32 %v1997_v13, %v1986_v19 }
 0x665   :  { %v1989_v25 = vadd.f32 %v1988_v23, %v1985_v38 }
 0x666   :  { %v1999_v21 = vrot.slane %v1998_v2, 4 }
 0x667   :  { %v1990_v51 = vrot.slane %v1989_v25, 4 }
 0x668   :  { %v2000_v10 = vadd.f32 %v1999_v21, %v1998_v2 }
 0x669   :  { %v1991_v46 = vadd.f32 %v1990_v51, %v1989_v25 }
 0x66a   :  { %v2001_v58 = vrot.slane %v2000_v10, 2 }
 0x66b   :  { %v1992_v59 = vrot.slane %v1991_v46, 2 }
 0x66c   :  { %v2002_v63 = vadd.f32 %v2001_v58, %v2000_v10 }
 0x66d   :  { %v1993_v1 = vadd.f32 %v1992_v59, %v1991_v46 }
 0x66e   :  { %v2003_v6 = vrot.slane %v2002_v63, 1 }
 0x66f   :  { %v1994_v7 = vrot.slane %v1993_v1, 1 }
 0x670   :  { %v2004_v49 = vadd.f32 %v2003_v6, %v2002_v63 }
 0x671   :  { %v1995_v62 = vadd.f32 %v1994_v7, %v1993_v1 }
 0x672   :  { %2069 = vmatprep.mubr.f32.mxu0 %v2004_v49 }
 0x673   :  { %2070 = vmatmul.mubr.f32.vlgmr.msra.gmra.mxu0 %v1995_v62 }
 0x733   :  { %v2524_v27 = vpop.f32.mrf.mxu0 }
 0x735   :  { %v2525_v28 = vpop.f32.mrf.mxu0 }
 0x736   :  { %v2526_v29 = vadd.f32 %v2525_v28, %v2524_v27 }
 0x738   :  { %v2075_v45 = vmul.f32 0.001953125, %v2526_v29 }
 0x73a   :  { %v2076_v15 = vadd.f32 1e-05, %v2075_v45 }
 0x73c   :  { %2538 = vrsqrt.f32 %v2076_v15 }
 0x749   :  { %v2539_v48 = vpop.eup %2538 }
 0x74a   :  { %2082 = vrot.lane.b32.xlu0 %v2539_v48, %s2546_s19  ;;  %2079 = vrot.lane.b32.xlu1 %v2539_v48, %s2544_s17 }
 0x74e   :  { %2088 = vrot.lane.b32.xlu0 %v2539_v48, %s2545_s18  ;;  %2085 = vrot.lane.b32.xlu1 %v2539_v48, %s2543_s2 }
 0x752   :  { %2094 = vrot.lane.b32.xlu0 %v2539_v48, %s2547_s20  ;;  %2091 = vrot.lane.b32.xlu1 %v2539_v48, %s2548_s0 }
 0x756   :  { %2097 = vrot.lane.b32.xlu1 %v2539_v48, %s2549_s21 }
 0x7bc   :  { %v2083_v60 = vpop.permute.xlu0 %2082  ;;  %v2080_v61 = vpop.permute.xlu1 %2079 }
 0x7bd   :  { %v2100_v47 = vsel %vm583_vm2, %v2539_v48, %v2080_v61 }
 0x7be   :  { %v2101_v43 = vsel %vm585_vm1, %v2100_v47, %v2083_v60 }
 0x7c0   :  { %v2089_v0 = vpop.permute.xlu0 %2088  ;;  %v2086_v44 = vpop.permute.xlu1 %2085 }
 0x7c1   :  { %v2102_v39 = vsel %vm587_vm3, %v2101_v43, %v2086_v44 }
 0x7c2   :  { %v2103_v3 = vsel %vm589_vm4, %v2102_v39, %v2089_v0 }
 0x7c4   :  { %v2092_v26 = vpop.permute.xlu1 %2091  ;;  %v2095_v56 = vpop.permute.xlu0 %2094 }
 0x7c5   :  { %v2104_v31 = vsel %vm591_vm5, %v2103_v3, %v2092_v26 }
 0x7c6   :  { %v2105_v32 = vsel %vm593_vm6, %v2104_v31, %v2095_v56 }
 0x7c8   :  { %v2098_v33 = vpop.permute.xlu1 %2097 }
 0x7c9   :  { %v2106_v4 = vsel %vm595_vm7, %v2105_v32, %v2098_v33 }
 0x7ca   :  { %v2108_v34 = vcombine.low %v2106_v4, %v2106_v4 }
 0x7cc   :  { %v2115_v8 = vrot.slane %v2108_v34, %v4294_v11 }
 0x7ce   :  { %v2122_v5 = vrot.slane %v2115_v8, %v4294_v11 }
 0x7d0   :  { %v2124_v14 = vmul.f32 %v2122_v5, %v1847_v37 }
 0x7d2   :  { %v2129_v30 = vrot.slane %v2124_v14, %v2940_v53  ;;  %v2133_v24 = vrot.slane %v2124_v14, %v2946_v57 }
 0x7d4   :  { %v2136_v55 = vmul.f32 %v2129_v30, %v4125_v17  ;;  %v2137_v12 = vmul.f32 %v2133_v24, %v4116_v42  ;;  %v2138_v41 = vmul.f32 %v2129_v30, %v4128_v50  ;;  %v2139_v20 = vmul.f32 %v2133_v24, %v4119_v36 }
 0x7d5   :  { %v2140_v22 = vmul.f32 %v2129_v30, %v4131_v54  ;;  %v2141_v19 = vmul.f32 %v2133_v24, %v4122_v52  ;;  %v2142_v13 = vmul.f32 %v2129_v30, %v4141_v35  ;;  %v2143_v38 = vmul.f32 %v2133_v24, %v4134_v18 }
 0x7d6   :  { %v2155_v23 = vadd.f32 %v2148_v40, %v2136_v55  ;;  %v2156_v53 = vadd.f32 %v2152_v16, %v2137_v12  ;;  %v2157_v2 = vadd.f32 %v2148_v40, %v2138_v41  ;;  %v2158_v57 = vadd.f32 %v2152_v16, %v2139_v20 }
 0x7d7   :  { %v2159_v25 = vadd.f32 %v2148_v40, %v2140_v22  ;;  %v2160_v17 = vadd.f32 %v2152_v16, %v2141_v19  ;;  %v2161_v21 = vadd.f32 %v2148_v40, %v2142_v13  ;;  %v2162_v42 = vadd.f32 %v2152_v16, %v2143_v38 }
 0x7d8   :  { %v2163_v51 = vmax.f32 %v2155_v23, 0.0  ;;  %v2164_v50 = vmax.f32 %v2156_v53, 0.0  ;;  %v2165_v10 = vmax.f32 %v2157_v2, 0.0  ;;  %v2166_v36 = vmax.f32 %v2158_v57, 0.0 }
 0x7d9   :  { %v2167_v46 = vmax.f32 %v2159_v25, 0.0  ;;  %v2168_v54 = vmax.f32 %v2160_v17, 0.0  ;;  %v2169_v58 = vmax.f32 %v2161_v21, 0.0  ;;  %v2170_v52 = vmax.f32 %v2162_v42, 0.0 }
 0x7da   :  { %2171 = vst [vmem:[%s4224_s11] sm:$0xff] %v2163_v51  ;;  %2172 = vst [vmem:[%s4224_s11 + $0x8] sm:$0xff] %v2164_v50 }
 0x7db   :  { %2173 = vst [vmem:[%s4224_s11 + $0x10] sm:$0xff] %v2165_v10  ;;  %2174 = vst [vmem:[%s4224_s11 + $0x18] sm:$0xff] %v2166_v36 }
 0x7dc   :  { %2175 = vst [vmem:[%s4224_s11 + $0x20] sm:$0xff] %v2167_v46  ;;  %2176 = vst [vmem:[%s4224_s11 + $0x28] sm:$0xff] %v2168_v54 }
 0x7dd   :  { %2177 = vst [vmem:[%s4224_s11 + $0x30] sm:$0xff] %v2169_v58  ;;  %2178 = vst [vmem:[%s4224_s11 + $0x38] sm:$0xff] %v2170_v52 }

</bundles_post_ra>
